<compile_context>
chip_gen: v6e
topology: v6e:2x2x1
jax: 0.10.0
libtpu: 0.0.40
codegen_flags: <defaults>
</compile_context>

<pallas_src>
import jax
import jax.numpy as jnp
from jax import lax
from jax.experimental import pallas as pl
from jax.experimental.pallas import tpu as pltpu


def _fused_decoder_kernel(x_ref, w1_ref, b1_ref, w2_ref, b2_ref, o_ref,
                          xpad_ref, hpad_ref):
    """Fused Conv3x3+ReLU -> Conv3x3+ReLU on one (NB, H, W, C) batch block.

    x_ref   : (NB, H, W, Cin)        input block (NHWC)
    w1_ref  : (9*Cin,  Cmid)         conv1 weights, im2col layout (ky, kx, cin)
    b1_ref  : (1, Cmid)              conv1 bias
    w2_ref  : (9*Cmid, Cout)         conv2 weights, im2col layout
    b2_ref  : (1, Cout)              conv2 bias
    o_ref   : (NB, H, W, Cout)       output block (NHWC)
    xpad_ref: (NB, H+2, W+2, Cin)    VMEM scratch: zero-padded input
    hpad_ref: (NB, H+2, W+2, Cmid)   VMEM scratch: zero-padded hidden act
    """
    NB, H, W, _ = x_ref.shape
    Cmid = hpad_ref.shape[-1]
    Cout = o_ref.shape[-1]

    def conv3x3_relu(pad_ref, w_ref, b_ref):
        cin = pad_ref.shape[-1]
        xp = pad_ref[...]                                # (NB, H+2, W+2, cin)
        # im2col: 9 shifted taps concatenated along channels -> K = 9*cin,
        # so the whole conv is one deep MXU matmul instead of 9 shallow ones.
        taps = [xp[:, ky:ky + H, kx:kx + W, :].reshape(NB * H * W, cin)
                for ky in range(3) for kx in range(3)]
        patch = jnp.concatenate(taps, axis=-1)           # (NB*H*W, 9*cin)
        acc = jnp.dot(patch, w_ref[...],
                      preferred_element_type=jnp.float32)
        acc = acc + b_ref[...]                           # (1, cout) broadcast
        return jnp.maximum(acc, 0.0)                     # fused ReLU

    # ---- Stage 1: build halo in VMEM (no HBM pad copy), conv1 + ReLU ----
    xpad_ref[...] = jnp.zeros_like(xpad_ref)
    xpad_ref[:, 1:H + 1, 1:W + 1, :] = x_ref[...].astype(xpad_ref.dtype)
    h = conv3x3_relu(xpad_ref, w1_ref, b1_ref)           # (NB*H*W, Cmid) f32

    # ---- Stage 2: hidden activation stays in VMEM (never written to HBM) ----
    hpad_ref[...] = jnp.zeros_like(hpad_ref)
    hpad_ref[:, 1:H + 1, 1:W + 1, :] = h.reshape(NB, H, W, Cmid)
    out = conv3x3_relu(hpad_ref, w2_ref, b2_ref)         # (NB*H*W, Cout) f32

    o_ref[...] = out.reshape(NB, H, W, Cout).astype(o_ref.dtype)


def _pick_batch_block(N, H, W):
    """Largest divisor of N such that the matmul M dim (NB*H*W) is large enough
    to fill the MXU / amortize per-step overhead while staying VMEM-friendly."""
    target_m = 512
    nb = max(1, min(N, target_m // max(H * W, 1)))
    while N % nb:
        nb -= 1
    return nb


def decoder_layer_forward_nhwc(x_nhwc, params):
    """Fused DecoderLayer forward: NHWC in, NHWC out (TPU-friendly layout)."""
    N, H, W, Cin = x_nhwc.shape
    w1, b1, w2, b2 = params["w1"], params["b1"], params["w2"], params["b2"]
    Cmid, Cout = w1.shape[-1], w2.shape[-1]

    # im2col weight layout: (3,3,Cin,Cout) -> (9*Cin, Cout);
    # row index = ky*3*Cin + kx*Cin + c, matching the kernel's tap concat order.
    w1r = w1.reshape(9 * Cin, Cmid)
    w2r = w2.reshape(9 * Cmid, Cout)
    b1r = b1.reshape(1, Cmid)
    b2r = b2.reshape(1, Cout)

    NB = _pick_batch_block(N, H, W)
    grid = (N // NB,)
    # TODO(synk): for large H*W add an H-row grid axis with a 1-row halo so the
    # per-step footprint also fits v7x's 64 MiB VMEM / v5e's scoped limit, and
    # so both v7x TensorCores stay busy when N is small.

    return pl.pallas_call(
        _fused_decoder_kernel,
        out_shape=jax.ShapeDtypeStruct((N, H, W, Cout), x_nhwc.dtype),
        grid=grid,
        in_specs=[
            pl.BlockSpec((NB, H, W, Cin), lambda n: (n, 0, 0, 0)),
            pl.BlockSpec((9 * Cin, Cmid), lambda n: (0, 0)),
            pl.BlockSpec((1, Cmid), lambda n: (0, 0)),
            pl.BlockSpec((9 * Cmid, Cout), lambda n: (0, 0)),
            pl.BlockSpec((1, Cout), lambda n: (0, 0)),
        ],
        out_specs=pl.BlockSpec((NB, H, W, Cout), lambda n: (n, 0, 0, 0)),
        scratch_shapes=[
            pltpu.VMEM((NB, H + 2, W + 2, Cin), jnp.float32),
            pltpu.VMEM((NB, H + 2, W + 2, Cmid), jnp.float32),
        ],
        compiler_params=pltpu.CompilerParams(
            dimension_semantics=("parallel",),
            vmem_limit_bytes=32 * 1024 * 1024),
    )(x_nhwc, w1r, b1r, w2r, b2r)


def decoder_layer_forward(x_nchw, params):
    """DecoderLayer.forward: NCHW in, NCHW out (matches the PyTorch module).

    When composing several layers, prefer decoder_layer_forward_nhwc so the
    per-layer NCHW<->NHWC boundary transposes (full HBM round trips) vanish.
    """
    x = jnp.transpose(x_nchw, (0, 2, 3, 1))  # NCHW -> NHWC
    x = decoder_layer_forward_nhwc(x, params)
    return jnp.transpose(x, (0, 3, 1, 2))    # NHWC -> NCHW


def init_params(key, out_channels):
    """Deterministic synthetic parameters (shapes match nn.Conv2d in __init__)."""
    k1, k2, k3, k4 = jax.random.split(key, 4)
    cin = 64
    # Conv1: 64 -> 64, 3x3.  Weights stored HWIO for the NHWC kernel.
    fan1 = cin * 3 * 3
    bound1 = 1.0 / jnp.sqrt(fan1)
    w1 = jax.random.uniform(k1, (3, 3, cin, 64), jnp.float32, -bound1, bound1)
    b1 = jax.random.uniform(k2, (64,), jnp.float32, -bound1, bound1)
    # Conv2: 64 -> out_channels, 3x3.
    fan2 = 64 * 3 * 3
    bound2 = 1.0 / jnp.sqrt(fan2)
    w2 = jax.random.uniform(k3, (3, 3, 64, out_channels), jnp.float32,
                            -bound2, bound2)
    b2 = jax.random.uniform(k4, (out_channels,), jnp.float32, -bound2, bound2)
    return {"w1": w1, "b1": b1, "w2": w2, "b2": b2}


def _reference_forward(x_nchw, params):
    """Pure-JAX reference (lax.conv) for a correctness check."""
    x = jnp.transpose(x_nchw, (0, 2, 3, 1))
    for w, b in ((params["w1"], params["b1"]), (params["w2"], params["b2"])):
        x = lax.conv_general_dilated(
            x, w, window_strides=(1, 1), padding="SAME",
            dimension_numbers=("NHWC", "HWIO", "NHWC"))
        x = jnp.maximum(x + b[None, None, None, :], 0.0)
    return jnp.transpose(x, (0, 3, 1, 2))


if __name__ == "__main__":
    key = jax.random.PRNGKey(0)
    k_params, k_x = jax.random.split(key)

    out_channels = 32
    params = init_params(k_params, out_channels)

    # Input: NCHW with in_channels fixed to 64 by the module, small spatial.
    x = jax.random.normal(k_x, (2, 64, 8, 8), jnp.float32)

    out = decoder_layer_forward(x, params)
    out = jax.block_until_ready(out)

    assert out.shape == (2, out_channels, 8, 8), out.shape

    ref = jax.block_until_ready(_reference_forward(x, params))
    assert jnp.allclose(out, ref, atol=1e-4, rtol=1e-4), (
        float(jnp.max(jnp.abs(out - ref))))

    print("KERNEL_OK")
</pallas_src>

<mosaic_0001>
module attributes {stable_mosaic.version = 11 : i64} {
  func.func @_fused_decoder_kernel(%arg0: i32, %arg1: memref<2x8x8x64xf32, #tpu.memory_space<vmem>>, %arg2: memref<576x64xf32, #tpu.memory_space<vmem>>, %arg3: memref<1x64xf32, #tpu.memory_space<vmem>>, %arg4: memref<576x32xf32, #tpu.memory_space<vmem>>, %arg5: memref<1x32xf32, #tpu.memory_space<vmem>>, %arg6: memref<2x8x8x32xf32, #tpu.memory_space<vmem>>, %arg7: memref<2x10x10x64xf32, #tpu.memory_space<vmem>>, %arg8: memref<2x10x10x64xf32, #tpu.memory_space<vmem>>) attributes {dimension_semantics = [#tpu.dimension_semantics<parallel>], iteration_bounds = array<i64: 1>, scalar_prefetch = 0 : i64, scratch_operands = 2 : i64, tpu.core_type = #tpu.core_type<tc>, window_params = [{transform_indices = @transform_0, window_bounds = array<i64: 2, 8, 8, 64>}, {pipeline_mode = #tpu.pipeline_mode<synchronous>, transform_indices = @transform_1, window_bounds = array<i64: 576, 64>}, {pipeline_mode = #tpu.pipeline_mode<synchronous>, transform_indices = @transform_2, window_bounds = array<i64: 1, 64>}, {pipeline_mode = #tpu.pipeline_mode<synchronous>, transform_indices = @transform_3, window_bounds = array<i64: 576, 32>}, {pipeline_mode = #tpu.pipeline_mode<synchronous>, transform_indices = @transform_4, window_bounds = array<i64: 1, 32>}, {transform_indices = @transform_5, window_bounds = array<i64: 2, 8, 8, 32>}]} {
    %cst = arith.constant 0.000000e+00 : f32
    %0 = vector.broadcast %cst : f32 to vector<2x10x10x64xf32>
    %c0 = arith.constant 0 : index
    %c0_0 = arith.constant 0 : index
    %c0_1 = arith.constant 0 : index
    %c0_2 = arith.constant 0 : index
    %1 = vector.load %arg7[%c0, %c0_0, %c0_1, %c0_2] : memref<2x10x10x64xf32, #tpu.memory_space<vmem>>, vector<2x10x10x64xf32>
    tpu.vector_store %arg7[%c0, %c0_0, %c0_1, %c0_2], %0 {strides = array<i32>} : memref<2x10x10x64xf32, #tpu.memory_space<vmem>>, vector<2x10x10x64xf32>,
    %c0_3 = arith.constant 0 : index
    %c0_4 = arith.constant 0 : index
    %c0_5 = arith.constant 0 : index
    %c0_6 = arith.constant 0 : index
    %2 = vector.load %arg1[%c0_3, %c0_4, %c0_5, %c0_6] : memref<2x8x8x64xf32, #tpu.memory_space<vmem>>, vector<2x8x8x64xf32>
    %c0_7 = arith.constant 0 : index
    %c1 = arith.constant 1 : index
    %c1_8 = arith.constant 1 : index
    %c0_9 = arith.constant 0 : index
    %3 = vector.load %arg7[%c0_7, %c1, %c1_8, %c0_9] : memref<2x10x10x64xf32, #tpu.memory_space<vmem>>, vector<2x8x8x64xf32>
    tpu.vector_store %arg7[%c0_7, %c1, %c1_8, %c0_9], %2 {strides = array<i32>} : memref<2x10x10x64xf32, #tpu.memory_space<vmem>>, vector<2x8x8x64xf32>,
    %c0_10 = arith.constant 0 : index
    %c0_11 = arith.constant 0 : index
    %c0_12 = arith.constant 0 : index
    %c0_13 = arith.constant 0 : index
    %4 = vector.load %arg7[%c0_10, %c0_11, %c0_12, %c0_13] : memref<2x10x10x64xf32, #tpu.memory_space<vmem>>, vector<2x10x10x64xf32>
    %5 = vector.extract_strided_slice %4 {offsets = [0, 0, 0, 0], sizes = [2, 8, 8, 64], strides = [1, 1, 1, 1]} : vector<2x10x10x64xf32> to vector<2x8x8x64xf32>
    %6 = vector.shape_cast %5 : vector<2x8x8x64xf32> to vector<128x64xf32>
    %7 = vector.extract_strided_slice %4 {offsets = [0, 0, 1, 0], sizes = [2, 8, 8, 64], strides = [1, 1, 1, 1]} : vector<2x10x10x64xf32> to vector<2x8x8x64xf32>
    %8 = vector.shape_cast %7 : vector<2x8x8x64xf32> to vector<128x64xf32>
    %9 = vector.extract_strided_slice %4 {offsets = [0, 0, 2, 0], sizes = [2, 8, 8, 64], strides = [1, 1, 1, 1]} : vector<2x10x10x64xf32> to vector<2x8x8x64xf32>
    %10 = vector.shape_cast %9 : vector<2x8x8x64xf32> to vector<128x64xf32>
    %11 = vector.extract_strided_slice %4 {offsets = [0, 1, 0, 0], sizes = [2, 8, 8, 64], strides = [1, 1, 1, 1]} : vector<2x10x10x64xf32> to vector<2x8x8x64xf32>
    %12 = vector.shape_cast %11 : vector<2x8x8x64xf32> to vector<128x64xf32>
    %13 = vector.extract_strided_slice %4 {offsets = [0, 1, 1, 0], sizes = [2, 8, 8, 64], strides = [1, 1, 1, 1]} : vector<2x10x10x64xf32> to vector<2x8x8x64xf32>
    %14 = vector.shape_cast %13 : vector<2x8x8x64xf32> to vector<128x64xf32>
    %15 = vector.extract_strided_slice %4 {offsets = [0, 1, 2, 0], sizes = [2, 8, 8, 64], strides = [1, 1, 1, 1]} : vector<2x10x10x64xf32> to vector<2x8x8x64xf32>
    %16 = vector.shape_cast %15 : vector<2x8x8x64xf32> to vector<128x64xf32>
    %17 = vector.extract_strided_slice %4 {offsets = [0, 2, 0, 0], sizes = [2, 8, 8, 64], strides = [1, 1, 1, 1]} : vector<2x10x10x64xf32> to vector<2x8x8x64xf32>
    %18 = vector.shape_cast %17 : vector<2x8x8x64xf32> to vector<128x64xf32>
    %19 = vector.extract_strided_slice %4 {offsets = [0, 2, 1, 0], sizes = [2, 8, 8, 64], strides = [1, 1, 1, 1]} : vector<2x10x10x64xf32> to vector<2x8x8x64xf32>
    %20 = vector.shape_cast %19 : vector<2x8x8x64xf32> to vector<128x64xf32>
    %21 = vector.extract_strided_slice %4 {offsets = [0, 2, 2, 0], sizes = [2, 8, 8, 64], strides = [1, 1, 1, 1]} : vector<2x10x10x64xf32> to vector<2x8x8x64xf32>
    %22 = vector.shape_cast %21 : vector<2x8x8x64xf32> to vector<128x64xf32>
    %23 = tpu.concatenate %6, %8, %10, %12, %14, %16, %18, %20, %22 in 1 : vector<128x64xf32>, vector<128x64xf32>, vector<128x64xf32>, vector<128x64xf32>, vector<128x64xf32>, vector<128x64xf32>, vector<128x64xf32>, vector<128x64xf32>, vector<128x64xf32> -> vector<128x576xf32>
    %c0_14 = arith.constant 0 : index
    %c0_15 = arith.constant 0 : index
    %24 = vector.load %arg2[%c0_14, %c0_15] : memref<576x64xf32, #tpu.memory_space<vmem>>, vector<576x64xf32>
    %cst_16 = arith.constant dense<0.000000e+00> : vector<128x64xf32>
    %25 = tpu.matmul %23, %24, %cst_16 {dimension_numbers = #tpu.dot_dimension_numbers<[1], [0], [0], [1], [0, 0, 1, 1], [], []>} : vector<128x576xf32>, vector<576x64xf32>, vector<128x64xf32> -> vector<128x64xf32>
    %c0_17 = arith.constant 0 : index
    %c0_18 = arith.constant 0 : index
    %26 = vector.load %arg3[%c0_17, %c0_18] : memref<1x64xf32, #tpu.memory_space<vmem>>, vector<1x64xf32>
    %27 = vector.broadcast %26 : vector<1x64xf32> to vector<128x64xf32>
    %28 = arith.addf %25, %27 : vector<128x64xf32>
    %cst_19 = arith.constant 0.000000e+00 : f32
    %29 = vector.broadcast %cst_19 : f32 to vector<128x64xf32>
    %30 = arith.maximumf %28, %29 : vector<128x64xf32>
    %cst_20 = arith.constant 0.000000e+00 : f32
    %31 = vector.broadcast %cst_20 : f32 to vector<2x10x10x64xf32>
    %c0_21 = arith.constant 0 : index
    %c0_22 = arith.constant 0 : index
    %c0_23 = arith.constant 0 : index
    %c0_24 = arith.constant 0 : index
    %32 = vector.load %arg8[%c0_21, %c0_22, %c0_23, %c0_24] : memref<2x10x10x64xf32, #tpu.memory_space<vmem>>, vector<2x10x10x64xf32>
    tpu.vector_store %arg8[%c0_21, %c0_22, %c0_23, %c0_24], %31 {strides = array<i32>} : memref<2x10x10x64xf32, #tpu.memory_space<vmem>>, vector<2x10x10x64xf32>,
    %33 = vector.shape_cast %30 : vector<128x64xf32> to vector<2x8x8x64xf32>
    %c0_25 = arith.constant 0 : index
    %c1_26 = arith.constant 1 : index
    %c1_27 = arith.constant 1 : index
    %c0_28 = arith.constant 0 : index
    %34 = vector.load %arg8[%c0_25, %c1_26, %c1_27, %c0_28] : memref<2x10x10x64xf32, #tpu.memory_space<vmem>>, vector<2x8x8x64xf32>
    tpu.vector_store %arg8[%c0_25, %c1_26, %c1_27, %c0_28], %33 {strides = array<i32>} : memref<2x10x10x64xf32, #tpu.memory_space<vmem>>, vector<2x8x8x64xf32>,
    %c0_29 = arith.constant 0 : index
    %c0_30 = arith.constant 0 : index
    %c0_31 = arith.constant 0 : index
    %c0_32 = arith.constant 0 : index
    %35 = vector.load %arg8[%c0_29, %c0_30, %c0_31, %c0_32] : memref<2x10x10x64xf32, #tpu.memory_space<vmem>>, vector<2x10x10x64xf32>
    %36 = vector.extract_strided_slice %35 {offsets = [0, 0, 0, 0], sizes = [2, 8, 8, 64], strides = [1, 1, 1, 1]} : vector<2x10x10x64xf32> to vector<2x8x8x64xf32>
    %37 = vector.shape_cast %36 : vector<2x8x8x64xf32> to vector<128x64xf32>
    %38 = vector.extract_strided_slice %35 {offsets = [0, 0, 1, 0], sizes = [2, 8, 8, 64], strides = [1, 1, 1, 1]} : vector<2x10x10x64xf32> to vector<2x8x8x64xf32>
    %39 = vector.shape_cast %38 : vector<2x8x8x64xf32> to vector<128x64xf32>
    %40 = vector.extract_strided_slice %35 {offsets = [0, 0, 2, 0], sizes = [2, 8, 8, 64], strides = [1, 1, 1, 1]} : vector<2x10x10x64xf32> to vector<2x8x8x64xf32>
    %41 = vector.shape_cast %40 : vector<2x8x8x64xf32> to vector<128x64xf32>
    %42 = vector.extract_strided_slice %35 {offsets = [0, 1, 0, 0], sizes = [2, 8, 8, 64], strides = [1, 1, 1, 1]} : vector<2x10x10x64xf32> to vector<2x8x8x64xf32>
    %43 = vector.shape_cast %42 : vector<2x8x8x64xf32> to vector<128x64xf32>
    %44 = vector.extract_strided_slice %35 {offsets = [0, 1, 1, 0], sizes = [2, 8, 8, 64], strides = [1, 1, 1, 1]} : vector<2x10x10x64xf32> to vector<2x8x8x64xf32>
    %45 = vector.shape_cast %44 : vector<2x8x8x64xf32> to vector<128x64xf32>
    %46 = vector.extract_strided_slice %35 {offsets = [0, 1, 2, 0], sizes = [2, 8, 8, 64], strides = [1, 1, 1, 1]} : vector<2x10x10x64xf32> to vector<2x8x8x64xf32>
    %47 = vector.shape_cast %46 : vector<2x8x8x64xf32> to vector<128x64xf32>
    %48 = vector.extract_strided_slice %35 {offsets = [0, 2, 0, 0], sizes = [2, 8, 8, 64], strides = [1, 1, 1, 1]} : vector<2x10x10x64xf32> to vector<2x8x8x64xf32>
    %49 = vector.shape_cast %48 : vector<2x8x8x64xf32> to vector<128x64xf32>
    %50 = vector.extract_strided_slice %35 {offsets = [0, 2, 1, 0], sizes = [2, 8, 8, 64], strides = [1, 1, 1, 1]} : vector<2x10x10x64xf32> to vector<2x8x8x64xf32>
    %51 = vector.shape_cast %50 : vector<2x8x8x64xf32> to vector<128x64xf32>
    %52 = vector.extract_strided_slice %35 {offsets = [0, 2, 2, 0], sizes = [2, 8, 8, 64], strides = [1, 1, 1, 1]} : vector<2x10x10x64xf32> to vector<2x8x8x64xf32>
    %53 = vector.shape_cast %52 : vector<2x8x8x64xf32> to vector<128x64xf32>
    %54 = tpu.concatenate %37, %39, %41, %43, %45, %47, %49, %51, %53 in 1 : vector<128x64xf32>, vector<128x64xf32>, vector<128x64xf32>, vector<128x64xf32>, vector<128x64xf32>, vector<128x64xf32>, vector<128x64xf32>, vector<128x64xf32>, vector<128x64xf32> -> vector<128x576xf32>
    %c0_33 = arith.constant 0 : index
    %c0_34 = arith.constant 0 : index
    %55 = vector.load %arg4[%c0_33, %c0_34] : memref<576x32xf32, #tpu.memory_space<vmem>>, vector<576x32xf32>
    %cst_35 = arith.constant dense<0.000000e+00> : vector<128x32xf32>
    %56 = tpu.matmul %54, %55, %cst_35 {dimension_numbers = #tpu.dot_dimension_numbers<[1], [0], [0], [1], [0, 0, 1, 1], [], []>} : vector<128x576xf32>, vector<576x32xf32>, vector<128x32xf32> -> vector<128x32xf32>
    %c0_36 = arith.constant 0 : index
    %c0_37 = arith.constant 0 : index
    %57 = vector.load %arg5[%c0_36, %c0_37] : memref<1x32xf32, #tpu.memory_space<vmem>>, vector<1x32xf32>
    %58 = vector.broadcast %57 : vector<1x32xf32> to vector<128x32xf32>
    %59 = arith.addf %56, %58 : vector<128x32xf32>
    %cst_38 = arith.constant 0.000000e+00 : f32
    %60 = vector.broadcast %cst_38 : f32 to vector<128x32xf32>
    %61 = arith.maximumf %59, %60 : vector<128x32xf32>
    %62 = vector.shape_cast %61 : vector<128x32xf32> to vector<2x8x8x32xf32>
    %c0_39 = arith.constant 0 : index
    %c0_40 = arith.constant 0 : index
    %c0_41 = arith.constant 0 : index
    %c0_42 = arith.constant 0 : index
    %63 = vector.load %arg6[%c0_39, %c0_40, %c0_41, %c0_42] : memref<2x8x8x32xf32, #tpu.memory_space<vmem>>, vector<2x8x8x32xf32>
    tpu.vector_store %arg6[%c0_39, %c0_40, %c0_41, %c0_42], %62 {strides = array<i32>} : memref<2x8x8x32xf32, #tpu.memory_space<vmem>>, vector<2x8x8x32xf32>,
    return
  }
  func.func @transform_0(%arg0: i32) -> (i32, i32, i32, i32) {
    %c0_i32 = arith.constant 0 : i32
    %c0_i32_0 = arith.constant 0 : i32
    %c0_i32_1 = arith.constant 0 : i32
    %c0_i32_2 = arith.constant 0 : i32
    return %arg0, %c0_i32, %c0_i32_0, %c0_i32_1 : i32, i32, i32, i32
  }
  func.func @transform_1(%arg0: i32) -> (i32, i32) {
    %c0_i32 = arith.constant 0 : i32
    %c0_i32_0 = arith.constant 0 : i32
    %c0_i32_1 = arith.constant 0 : i32
    return %c0_i32, %c0_i32_0 : i32, i32
  }
  func.func @transform_2(%arg0: i32) -> (i32, i32) {
    %c0_i32 = arith.constant 0 : i32
    %c0_i32_0 = arith.constant 0 : i32
    %c0_i32_1 = arith.constant 0 : i32
    return %c0_i32, %c0_i32_0 : i32, i32
  }
  func.func @transform_3(%arg0: i32) -> (i32, i32) {
    %c0_i32 = arith.constant 0 : i32
    %c0_i32_0 = arith.constant 0 : i32
    %c0_i32_1 = arith.constant 0 : i32
    return %c0_i32, %c0_i32_0 : i32, i32
  }
  func.func @transform_4(%arg0: i32) -> (i32, i32) {
    %c0_i32 = arith.constant 0 : i32
    %c0_i32_0 = arith.constant 0 : i32
    %c0_i32_1 = arith.constant 0 : i32
    return %c0_i32, %c0_i32_0 : i32, i32
  }
  func.func @transform_5(%arg0: i32) -> (i32, i32, i32, i32) {
    %c0_i32 = arith.constant 0 : i32
    %c0_i32_0 = arith.constant 0 : i32
    %c0_i32_1 = arith.constant 0 : i32
    %c0_i32_2 = arith.constant 0 : i32
    return %arg0, %c0_i32, %c0_i32_0, %c0_i32_1 : i32, i32, i32, i32
  }
}

</mosaic_0001>

<bundles_post_ra>
// kernel: tpu_custom_call.1
= control target key start
LH: loop header
LB: loop body
LE: loop exit
PB: predicated region body
PF: predicated region fallthrough
CT: control target
= control target key end

     0   :  { %vm21_vm0 = vcmask 523264   ;;  %vm23_vm1 = vcmask 517120   ;;  %v2916_v1 = vmov 0.0   ;;  %vm168_vm2 = vcmask 1046528   ;;  %s2917_s11 = smov 64   ;;  %s4941_s0 = inlined_call_operand.vmem [shape: f32[2,8,8,64], index: 0, kind: input, shape index: {}]   ;;  %s4942_s1 = inlined_call_operand.vmem [shape: f32[576,64], index: 1, kind: input, shape index: {}]   ;;  %s4943_s2 = inlined_call_operand.vmem [shape: f32[1,64], index: 2, kind: input, shape index: {}]   ;;  %s4944_s3 = inlined_call_operand.vmem [shape: f32[576,32], index: 3, kind: input, shape index: {}]   ;;  %s4945_s4 = inlined_call_operand.vmem [shape: f32[1,32], index: 4, kind: input, shape index: {}]   ;;  %s4946_s5 = inlined_call_operand.hbm [shape: f32[2,8,8,32], index: 5, kind: output, shape index: {}]  }
   0x1   :  { %v2954_v0 = vld [vmem:[%s4941_s0] sm:$0xff]  ;;  %22 = vst.msk [vmem:[#allocation2] sm:$0xff] %vm21_vm0, %v2916_v1  ;;  %25 = vst.msk [vmem:[#allocation2 + $0x10] sm:$0xff] %vm21_vm0, %v2916_v1  ;;  %v64_v2 = vld [vmem:[%s4941_s0 + $0x8] sm:$0xff]  ;;  %vm217_vm3 = vcmask 1045504  }
   0x2   :  { %24 = vst.msk [vmem:[#allocation2 + $0x8] sm:$0x3] %vm23_vm1, %v2916_v1  ;;  %26 = vst.msk [vmem:[#allocation2 + $0x18] sm:$0x3] %vm23_vm1, %v2916_v1  ;;  %v65_v3 = vld [vmem:[%s4941_s0 + $0x10] sm:$0xff]  ;;  %v66_v4 = vld [vmem:[%s4941_s0 + $0x18] sm:$0xff] }
   0x3   :  { %27 = vst.msk [vmem:[#allocation2 + $0x20] sm:$0xff] %vm21_vm0, %v2916_v1  ;;  %29 = vst.msk [vmem:[#allocation2 + $0x30] sm:$0xff] %vm21_vm0, %v2916_v1  ;;  %v67_v5 = vld [vmem:[%s4941_s0 + $0x20] sm:$0xff]  ;;  %v68_v6 = vld [vmem:[%s4941_s0 + $0x28] sm:$0xff] }
   0x4   :  { %28 = vst.msk [vmem:[#allocation2 + $0x28] sm:$0x3] %vm23_vm1, %v2916_v1  ;;  %30 = vst.msk [vmem:[#allocation2 + $0x38] sm:$0x3] %vm23_vm1, %v2916_v1  ;;  %v69_v7 = vld [vmem:[%s4941_s0 + $0x30] sm:$0xff]  ;;  %v70_v8 = vld [vmem:[%s4941_s0 + $0x38] sm:$0xff] }
   0x5   :  { %31 = vst.msk [vmem:[#allocation2 + $0x40] sm:$0xff] %vm21_vm0, %v2916_v1  ;;  %33 = vst.msk [vmem:[#allocation2 + $0x50] sm:$0xff] %vm21_vm0, %v2916_v1  ;;  %v71_v9 = vld [vmem:[%s4941_s0 + $0x40] sm:$0xff]  ;;  %v72_v10 = vld [vmem:[%s4941_s0 + $0x48] sm:$0xff] }
   0x6   :  { %32 = vst.msk [vmem:[#allocation2 + $0x48] sm:$0x3] %vm23_vm1, %v2916_v1  ;;  %34 = vst.msk [vmem:[#allocation2 + $0x58] sm:$0x3] %vm23_vm1, %v2916_v1  ;;  %v73_v11 = vld [vmem:[%s4941_s0 + $0x50] sm:$0xff]  ;;  %v74_v12 = vld [vmem:[%s4941_s0 + $0x58] sm:$0xff] }
   0x7   :  { %35 = vst.msk [vmem:[#allocation2 + $0x60] sm:$0xff] %vm21_vm0, %v2916_v1  ;;  %37 = vst.msk [vmem:[#allocation2 + $0x70] sm:$0xff] %vm21_vm0, %v2916_v1  ;;  %v75_v13 = vld [vmem:[%s4941_s0 + $0x60] sm:$0xff]  ;;  %v76_v14 = vld [vmem:[%s4941_s0 + $0x68] sm:$0xff] }
   0x8   :  { %36 = vst.msk [vmem:[#allocation2 + $0x68] sm:$0x3] %vm23_vm1, %v2916_v1  ;;  %38 = vst.msk [vmem:[#allocation2 + $0x78] sm:$0x3] %vm23_vm1, %v2916_v1  ;;  %v77_v15 = vld [vmem:[%s4941_s0 + $0x70] sm:$0xff]  ;;  %v78_v16 = vld [vmem:[%s4941_s0 + $0x78] sm:$0xff] }
   0x9   :  { %39 = vst.msk [vmem:[#allocation2 + $0x80] sm:$0xff] %vm21_vm0, %v2916_v1  ;;  %41 = vst.msk [vmem:[#allocation2 + $0x90] sm:$0xff] %vm21_vm0, %v2916_v1  ;;  %v569_v17 = vld [vmem:[%s4942_s1 + $0xf8] sm:$0xff]  ;;  %v568_v19 = vld [vmem:[%s4942_s1 + $0xf0] sm:$0xff] }
   0xa   :  { %40 = vst.msk [vmem:[#allocation2 + $0x88] sm:$0x3] %vm23_vm1, %v2916_v1  ;;  %42 = vst.msk [vmem:[#allocation2 + $0x98] sm:$0x3] %vm23_vm1, %v2916_v1  ;;  %v553_v18 = vld [vmem:[%s4942_s1 + $0x78] sm:$0xff]  ;;  %2226 = vmatprep.subr.mxu0 %v569_v17  ;;  %v552_v20 = vld [vmem:[%s4942_s1 + $0x70] sm:$0xff] }
   0xb   :  { %43 = vst.msk [vmem:[#allocation2 + $0xa0] sm:$0xff] %vm21_vm0, %v2916_v1  ;;  %45 = vst.msk [vmem:[#allocation2 + $0xb0] sm:$0xff] %vm21_vm0, %v2916_v1  ;;  %v567_v21 = vld [vmem:[%s4942_s1 + $0xe8] sm:$0xff]  ;;  %v3193_v22 = vld [vmem:[#allocation2] sm:$0xff]  ;;  %2227 = vmatpush3.msra.mxu0 %v553_v18 }
   0xc   :  { %44 = vst.msk [vmem:[#allocation2 + $0xa8] sm:$0x3] %vm23_vm1, %v2916_v1  ;;  %46 = vst.msk [vmem:[#allocation2 + $0xb8] sm:$0x3] %vm23_vm1, %v2916_v1  ;;  %v3195_v23 = vld [vmem:[#allocation2 + $0x8] sm:$0x3]  ;;  %2228 = vmatprep.subr.mxu0 %v568_v19 }
   0xd   :  { %47 = vst.msk [vmem:[#allocation2 + $0xc0] sm:$0xff] %vm21_vm0, %v2916_v1  ;;  %49 = vst.msk [vmem:[#allocation2 + $0xd0] sm:$0xff] %vm21_vm0, %v2916_v1  ;;  %v551_v24 = vld [vmem:[%s4942_s1 + $0x68] sm:$0xff]  ;;  %v169_v26 = vrot.slane %v3193_v22, 1  ;;  %v170_v27 = vrot.slane %v3195_v23, 1  ;;  %2229 = vmatpush3.msra.mxu0 %v552_v20  ;;  %v566_v19 = vld [vmem:[%s4942_s1 + $0xe0] sm:$0xff] }
   0xe   :  { %48 = vst.msk [vmem:[#allocation2 + $0xc8] sm:$0x3] %vm23_vm1, %v2916_v1  ;;  %50 = vst.msk [vmem:[#allocation2 + $0xd8] sm:$0x3] %vm23_vm1, %v2916_v1  ;;  %2230 = vmatprep.subr.mxu0 %v567_v21 }
   0xf   :  { %51 = vst.msk [vmem:[#allocation2 + $0xe0] sm:$0xff] %vm21_vm0, %v2916_v1  ;;  %53 = vst.msk [vmem:[#allocation2 + $0xf0] sm:$0xff] %vm21_vm0, %v2916_v1  ;;  %v171_v35 = vsel %vm168_vm2, %v169_v26, %v170_v27  ;;  %2231 = vmatpush3.msra.mxu0 %v551_v24 }
  0x10   :  { %52 = vst.msk [vmem:[#allocation2 + $0xe8] sm:$0x3] %vm23_vm1, %v2916_v1  ;;  %54 = vst.msk [vmem:[#allocation2 + $0xf8] sm:$0x3] %vm23_vm1, %v2916_v1  ;;  %2232 = vmatprep.subr.mxu0 %v566_v19  ;;  %v546_v19 = vld [vmem:[%s4942_s1 + $0x40] sm:$0xff] }
  0x11   :  { %55 = vst.msk [vmem:[#allocation2 + $0x100] sm:$0xff] %vm21_vm0, %v2916_v1  ;;  %57 = vst.msk [vmem:[#allocation2 + $0x110] sm:$0xff] %vm21_vm0, %v2916_v1 }
  0x12   :  { %56 = vst.msk [vmem:[#allocation2 + $0x108] sm:$0x3] %vm23_vm1, %v2916_v1  ;;  %58 = vst.msk [vmem:[#allocation2 + $0x118] sm:$0x3] %vm23_vm1, %v2916_v1 }
  0x13   :  { %59 = vst.msk [vmem:[#allocation2 + $0x120] sm:$0xff] %vm21_vm0, %v2916_v1  ;;  %61 = vst.msk [vmem:[#allocation2 + $0x130] sm:$0xff] %vm21_vm0, %v2916_v1 }
  0x14   :  { %60 = vst.msk [vmem:[#allocation2 + $0x128] sm:$0x3] %vm23_vm1, %v2916_v1  ;;  %62 = vst.msk [vmem:[#allocation2 + $0x138] sm:$0x3] %vm23_vm1, %v2916_v1 }
  0x15   :  { %1100 = vst.msk [vmem:[#allocation3] sm:$0xff] %vm21_vm0, %v2916_v1  ;;  %1102 = vst.msk [vmem:[#allocation3 + $0x10] sm:$0xff] %vm21_vm0, %v2916_v1 }
  0x16   :  { %1101 = vst.msk [vmem:[#allocation3 + $0x8] sm:$0x3] %vm23_vm1, %v2916_v1  ;;  %1103 = vst.msk [vmem:[#allocation3 + $0x18] sm:$0x3] %vm23_vm1, %v2916_v1 }
  0x17   :  { %1104 = vst.msk [vmem:[#allocation3 + $0x20] sm:$0xff] %vm21_vm0, %v2916_v1  ;;  %1106 = vst.msk [vmem:[#allocation3 + $0x30] sm:$0xff] %vm21_vm0, %v2916_v1 }
  0x18   :  { %1105 = vst.msk [vmem:[#allocation3 + $0x28] sm:$0x3] %vm23_vm1, %v2916_v1  ;;  %1107 = vst.msk [vmem:[#allocation3 + $0x38] sm:$0x3] %vm23_vm1, %v2916_v1 }
  0x19   :  { %1108 = vst.msk [vmem:[#allocation3 + $0x40] sm:$0xff] %vm21_vm0, %v2916_v1  ;;  %1110 = vst.msk [vmem:[#allocation3 + $0x50] sm:$0xff] %vm21_vm0, %v2916_v1 }
  0x1a   :  { %1109 = vst.msk [vmem:[#allocation3 + $0x48] sm:$0x3] %vm23_vm1, %v2916_v1  ;;  %1111 = vst.msk [vmem:[#allocation3 + $0x58] sm:$0x3] %vm23_vm1, %v2916_v1 }
  0x1b   :  { %1112 = vst.msk [vmem:[#allocation3 + $0x60] sm:$0xff] %vm21_vm0, %v2916_v1  ;;  %1114 = vst.msk [vmem:[#allocation3 + $0x70] sm:$0xff] %vm21_vm0, %v2916_v1 }
  0x1c   :  { %1113 = vst.msk [vmem:[#allocation3 + $0x68] sm:$0x3] %vm23_vm1, %v2916_v1  ;;  %1115 = vst.msk [vmem:[#allocation3 + $0x78] sm:$0x3] %vm23_vm1, %v2916_v1 }
  0x1d   :  { %1116 = vst.msk [vmem:[#allocation3 + $0x80] sm:$0xff] %vm21_vm0, %v2916_v1  ;;  %1118 = vst.msk [vmem:[#allocation3 + $0x90] sm:$0xff] %vm21_vm0, %v2916_v1 }
  0x1e   :  { %1117 = vst.msk [vmem:[#allocation3 + $0x88] sm:$0x3] %vm23_vm1, %v2916_v1  ;;  %1119 = vst.msk [vmem:[#allocation3 + $0x98] sm:$0x3] %vm23_vm1, %v2916_v1 }
  0x1f   :  { %1120 = vst.msk [vmem:[#allocation3 + $0xa0] sm:$0xff] %vm21_vm0, %v2916_v1  ;;  %1122 = vst.msk [vmem:[#allocation3 + $0xb0] sm:$0xff] %vm21_vm0, %v2916_v1 }
  0x20   :  { %1121 = vst.msk [vmem:[#allocation3 + $0xa8] sm:$0x3] %vm23_vm1, %v2916_v1  ;;  %1123 = vst.msk [vmem:[#allocation3 + $0xb8] sm:$0x3] %vm23_vm1, %v2916_v1 }
  0x21   :  { %1124 = vst.msk [vmem:[#allocation3 + $0xc0] sm:$0xff] %vm21_vm0, %v2916_v1  ;;  %1126 = vst.msk [vmem:[#allocation3 + $0xd0] sm:$0xff] %vm21_vm0, %v2916_v1 }
  0x22   :  { %1125 = vst.msk [vmem:[#allocation3 + $0xc8] sm:$0x3] %vm23_vm1, %v2916_v1  ;;  %1127 = vst.msk [vmem:[#allocation3 + $0xd8] sm:$0x3] %vm23_vm1, %v2916_v1 }
  0x23   :  { %1128 = vst.msk [vmem:[#allocation3 + $0xe0] sm:$0xff] %vm21_vm0, %v2916_v1  ;;  %1130 = vst.msk [vmem:[#allocation3 + $0xf0] sm:$0xff] %vm21_vm0, %v2916_v1 }
  0x24   :  { %1129 = vst.msk [vmem:[#allocation3 + $0xe8] sm:$0x3] %vm23_vm1, %v2916_v1  ;;  %1131 = vst.msk [vmem:[#allocation3 + $0xf8] sm:$0x3] %vm23_vm1, %v2916_v1 }
  0x25   :  { %1132 = vst.msk [vmem:[#allocation3 + $0x100] sm:$0xff] %vm21_vm0, %v2916_v1  ;;  %1134 = vst.msk [vmem:[#allocation3 + $0x110] sm:$0xff] %vm21_vm0, %v2916_v1 }
  0x26   :  { %1133 = vst.msk [vmem:[#allocation3 + $0x108] sm:$0x3] %vm23_vm1, %v2916_v1  ;;  %1135 = vst.msk [vmem:[#allocation3 + $0x118] sm:$0x3] %vm23_vm1, %v2916_v1 }
  0x27   :  { %1136 = vst.msk [vmem:[#allocation3 + $0x120] sm:$0xff] %vm21_vm0, %v2916_v1  ;;  %1138 = vst.msk [vmem:[#allocation3 + $0x130] sm:$0xff] %vm21_vm0, %v2916_v1 }
  0x28   :  { %1137 = vst.msk [vmem:[#allocation3 + $0x128] sm:$0x3] %vm23_vm1, %v2916_v1  ;;  %1139 = vst.msk [vmem:[#allocation3 + $0x138] sm:$0x3] %vm23_vm1, %v2916_v1  ;;  %v3269_v1 = vld [vmem:[#allocation2 + $0xa0] sm:$0xff] }
  0x29   :  { %80 = vst.msk [vmem:[#allocation2 + $0x11] sm:$0xff] %vm21_vm0, %v2954_v0  ;;  %81 = vst.msk [vmem:[#allocation2 + $0x21] sm:$0xff] %vm21_vm0, %v64_v2  ;;  %v3271_v2 = vld [vmem:[#allocation2 + $0xa8] sm:$0x3] }
  0x2a   :  { %82 = vst.msk [vmem:[#allocation2 + $0x31] sm:$0xff] %vm21_vm0, %v65_v3  ;;  %83 = vst.msk [vmem:[#allocation2 + $0x41] sm:$0xff] %vm21_vm0, %v66_v4 }
  0x2b   :  { %84 = vst.msk [vmem:[#allocation2 + $0x51] sm:$0xff] %vm21_vm0, %v67_v5  ;;  %85 = vst.msk [vmem:[#allocation2 + $0x61] sm:$0xff] %vm21_vm0, %v68_v6 }
  0x2c   :  { %86 = vst.msk [vmem:[#allocation2 + $0x71] sm:$0xff] %vm21_vm0, %v69_v7  ;;  %87 = vst.msk [vmem:[#allocation2 + $0x81] sm:$0xff] %vm21_vm0, %v70_v8  ;;  %v193_v8 = vrot.slane %v3269_v1, 1 }
  0x2d   :  { %88 = vst.msk [vmem:[#allocation2 + $0xb1] sm:$0xff] %vm21_vm0, %v71_v9  ;;  %89 = vst.msk [vmem:[#allocation2 + $0xc1] sm:$0xff] %vm21_vm0, %v72_v10  ;;  %v194_v9 = vrot.slane %v3271_v2, 1 }
  0x2e   :  { %90 = vst.msk [vmem:[#allocation2 + $0xd1] sm:$0xff] %vm21_vm0, %v73_v11  ;;  %91 = vst.msk [vmem:[#allocation2 + $0xe1] sm:$0xff] %vm21_vm0, %v74_v12 }
  0x2f   :  { %92 = vst.msk [vmem:[#allocation2 + $0xf1] sm:$0xff] %vm21_vm0, %v75_v13  ;;  %93 = vst.msk [vmem:[#allocation2 + $0x101] sm:$0xff] %vm21_vm0, %v76_v14  ;;  %v195_v21 = vsel %vm168_vm2, %v193_v8, %v194_v9 }
  0x30   :  { %94 = vst.msk [vmem:[#allocation2 + $0x111] sm:$0xff] %vm21_vm0, %v77_v15  ;;  %95 = vst.msk [vmem:[#allocation2 + $0x121] sm:$0xff] %vm21_vm0, %v78_v16  ;;  %v3200_v25 = vld [vmem:[#allocation2 + $0x10] sm:$0xff]  ;;  %v3204_v28 = vld [vmem:[#allocation2 + $0x20] sm:$0xff] }
  0x31   :  { %v3206_v29 = vld [vmem:[#allocation2 + $0x28] sm:$0x3]  ;;  %v3208_v30 = vld [vmem:[#allocation2 + $0x30] sm:$0xff]  ;;  %v175_v31 = vrot.slane %v3204_v28, 1  ;;  %v3212_v33 = vld [vmem:[#allocation2 + $0x18] sm:$0x3]  ;;  %v2679_v41 = vpack.i.bf16 %v171_v35, %v3200_v25 }
  0x32   :  { %v176_v32 = vrot.slane %v3206_v29, 1  ;;  %v172_v34 = vrot.slane %v3200_v25, 1  ;;  %v173_v36 = vrot.slane %v3212_v33, 1  ;;  %v3217_v37 = vld [vmem:[#allocation2 + $0x38] sm:$0x3]  ;;  %v3219_v38 = vld [vmem:[#allocation2 + $0x40] sm:$0xff] }
  0x33   :  { %v178_v39 = vrot.slane %v3208_v30, 1  ;;  %v3222_v40 = vld [vmem:[#allocation2 + $0x50] sm:$0xff]  ;;  %v179_v43 = vrot.slane %v3217_v37, 1  ;;  %v3229_v44 = vld [vmem:[#allocation2 + $0x48] sm:$0x3]  ;;  %v181_v45 = vrot.slane %v3219_v38, 1  ;;  %2680 = vrot.lane.b32.xlu0 %v2679_v41, %s2917_s11 }
  0x34   :  { %v3226_v42 = vsel %vm168_vm2, %v175_v31, %v176_v32  ;;  %v3232_v46 = vld [vmem:[#allocation2 + $0x58] sm:$0x3]  ;;  %v3237_v48 = vsel %vm168_vm2, %v172_v34, %v173_v36  ;;  %v182_v49 = vrot.slane %v3229_v44, 1  ;;  %v3240_v50 = vld [vmem:[#allocation2 + $0x60] sm:$0xff]  ;;  %v184_v51 = vrot.slane %v3222_v40, 1  ;;  %v3245_v53 = vld [vmem:[#allocation2 + $0x70] sm:$0xff] }
  0x35   :  { %v2689_v47 = vpack.i.bf16 %v3226_v42, %v3208_v30  ;;  %v3243_v52 = vld [vmem:[#allocation2 + $0x68] sm:$0x3]  ;;  %v2684_v54 = vpack.i.bf16 %v3237_v48, %v3204_v28  ;;  %v3251_v55 = vsel %vm168_vm2, %v178_v39, %v179_v43  ;;  %v185_v56 = vrot.slane %v3232_v46, 1  ;;  %v3254_v57 = vld [vmem:[#allocation2 + $0x78] sm:$0x3]  ;;  %v3273_v3 = vld [vmem:[#allocation2 + $0xb0] sm:$0xff] }
  0x36   :  { %v2694_v58 = vpack.i.bf16 %v3251_v55, %v3219_v38  ;;  %v3260_v59 = vsel %vm168_vm2, %v181_v45, %v182_v49  ;;  %v187_v60 = vrot.slane %v3240_v50, 1  ;;  %v188_v61 = vrot.slane %v3243_v52, 1  ;;  %v3275_v4 = vld [vmem:[#allocation2 + $0xb8] sm:$0x3]  ;;  %v3288_v10 = vld [vmem:[#allocation2 + $0x80] sm:$0xff]  ;;  %v3299_v16 = vld [vmem:[#allocation2 + $0xd0] sm:$0xff] }
  0x37   :  { %2690 = vrot.lane.b32.xlu1 %v2689_v47, %s2917_s11  ;;  %v3265_v62 = vsel %vm168_vm2, %v184_v51, %v185_v56  ;;  %v190_v63 = vrot.slane %v3245_v53, 1  ;;  %v191_v0 = vrot.slane %v3254_v57, 1  ;;  %2685 = vrot.lane.b32.xlu0 %v2684_v54, %s2917_s11  ;;  %v2699_v5 = vpack.i.bf16 %v3260_v59, %v3222_v40  ;;  %v3293_v12 = vld [vmem:[#allocation2 + $0xc0] sm:$0xff]  ;;  %v3297_v15 = vld [vmem:[#allocation2 + $0xc8] sm:$0x3]  ;;  %v565_v32 = vld [vmem:[%s4942_s1 + $0xd8] sm:$0xff] }
  0x38   :  { %v2704_v6 = vpack.i.bf16 %v3265_v62, %v3240_v50  ;;  %v3284_v7 = vsel %vm168_vm2, %v187_v60, %v188_v61  ;;  %v196_v13 = vrot.slane %v3273_v3, 1  ;;  %v197_v14 = vrot.slane %v3275_v4, 1  ;;  %v3301_v17 = vld [vmem:[#allocation2 + $0xd8] sm:$0x3]  ;;  %v3315_v27 = vld [vmem:[#allocation2 + $0xe0] sm:$0xff]  ;;  %v564_v43 = vld [vmem:[%s4942_s1 + $0xd0] sm:$0xff] }
  0x39   :  { %v3291_v11 = vsel %vm168_vm2, %v190_v63, %v191_v0  ;;  %v2709_v18 = vpack.i.bf16 %v3284_v7, %v3245_v53  ;;  %v199_v24 = vrot.slane %v3293_v12, 1  ;;  %v200_v26 = vrot.slane %v3297_v15, 1  ;;  %v550_v31 = vld [vmem:[%s4942_s1 + $0x60] sm:$0xff]  ;;  %v3328_v39 = vld [vmem:[#allocation2 + $0xe8] sm:$0x3]  ;;  %v549_v41 = vld [vmem:[%s4942_s1 + $0x58] sm:$0xff] }
  0x3a   :  { %v2714_v20 = vpack.i.bf16 %v3291_v11, %v3288_v10  ;;  %v3324_v34 = vsel %vm168_vm2, %v196_v13, %v197_v14  ;;  %v202_v35 = vrot.slane %v3299_v16, 1  ;;  %v203_v36 = vrot.slane %v3301_v17, 1  ;;  %2233 = vmatpush3.msra.mxu0 %v550_v31  ;;  %v3336_v45 = vld [vmem:[#allocation2 + $0xf0] sm:$0xff]  ;;  %v3338_v47 = vld [vmem:[#allocation2 + $0xf8] sm:$0x3]  ;;  %v563_v54 = vld [vmem:[%s4942_s1 + $0xc8] sm:$0xff] }
  0x3b   :  { %2695 = vrot.lane.b32.xlu1 %v2694_v58, %s2917_s11  ;;  %2700 = vrot.lane.b32.xlu0 %v2699_v5, %s2917_s11  ;;  %v548_v49 = vld [vmem:[%s4942_s1 + $0x50] sm:$0xff]  ;;  %v2719_v51 = vpack.i.bf16 %v195_v21, %v3273_v3  ;;  %v2724_v56 = vpack.i.bf16 %v3324_v34, %v3293_v12  ;;  %v3352_v58 = vsel %vm168_vm2, %v199_v24, %v200_v26  ;;  %v205_v60 = vrot.slane %v3315_v27, 1  ;;  %v547_v63 = vld [vmem:[%s4942_s1 + $0x48] sm:$0xff]  ;;  %v3362_v5 = vld [vmem:[#allocation2 + $0x100] sm:$0xff] }
  0x3c   :  { %2234 = vmatprep.subr.mxu0 %v565_v32  ;;  %4964 = vst [vmem:[#allocation7_spill] sm:$0xff] %v3352_v58  ;;  %v206_v61 = vrot.slane %v3328_v39, 1  ;;  %v3360_v0 = vsel %vm168_vm2, %v202_v35, %v203_v36  ;;  %v209_v8 = vrot.slane %v3338_v47, 1  ;;  %v3366_v9 = vld [vmem:[#allocation2 + $0x108] sm:$0x3]  ;;  %v562_v13 = vld [vmem:[%s4942_s1 + $0xc0] sm:$0xff] }
  0x3d   :  { %2235 = vmatpush3.msra.mxu0 %v549_v41  ;;  %4965 = vst [vmem:[#allocation8_spill] sm:$0xff] %v3360_v0  ;;  %v3371_v14 = vld [vmem:[#allocation2 + $0x110] sm:$0xff]  ;;  %v561_v21 = vld [vmem:[%s4942_s1 + $0xb8] sm:$0xff]  ;;  %v2734_v24 = vpack.i.bf16 %v3360_v0, %v3315_v27  ;;  %v211_v31 = vrot.slane %v3362_v5, 1  ;;  %v212_v32 = vrot.slane %v3366_v9, 1 }
  0x3e   :  { %2236 = vmatprep.subr.mxu0 %v564_v43  ;;  %v3388_v26 = vsel %vm168_vm2, %v205_v60, %v206_v61  ;;  %v545_v35 = vld [vmem:[%s4942_s1 + $0x38] sm:$0xff]  ;;  %v214_v43 = vrot.slane %v3371_v14, 1  ;;  %v600_v60 = vld [vmem:[%s4942_s1 + $0x1f0] sm:$0xff] }
  0x3f   :  { %2705 = vrot.lane.b32.xlu1 %v2704_v6, %s2917_s11  ;;  %2710 = vrot.lane.b32.xlu0 %v2709_v18, %s2917_s11  ;;  %v208_v6 = vrot.slane %v3336_v45, 1  ;;  %v3373_v18 = vld [vmem:[#allocation2 + $0x118] sm:$0x3]  ;;  %4966 = vst [vmem:[#allocation9_spill] sm:$0xff] %v3388_v26  ;;  %v2739_v61 = vpack.i.bf16 %v3388_v26, %v3336_v45 }
  0x40   :  { %2237 = vmatpush3.msra.mxu0 %v548_v49  ;;  %v601_v36 = vld [vmem:[%s4942_s1 + $0x1f8] sm:$0xff]  ;;  %v215_v49 = vrot.slane %v3373_v18, 1 }
  0x41   :  { %2238 = vmatprep.subr.mxu0 %v563_v54  ;;  %v3399_v41 = vsel %vm168_vm2, %v208_v6, %v209_v8  ;;  %2306 = vmatprep.subr.mxu1 %v601_v36  ;;  %v585_v54 = vld [vmem:[%s4942_s1 + $0x178] sm:$0xff]  ;;  %v584_v6 = vld [vmem:[%s4942_s1 + $0x170] sm:$0xff] }
  0x42   :  { %2239 = vmatpush3.msra.mxu0 %v547_v63  ;;  %4967 = vst [vmem:[#allocation10_spill] sm:$0xff] %v3399_v41  ;;  %2307 = vmatpush3.msra.mxu1 %v585_v54  ;;  %v559_v63 = vld [vmem:[%s4942_s1 + $0xa8] sm:$0xff]  ;;  %v2744_v8 = vpack.i.bf16 %v3399_v41, %v3362_v5  ;;  %v557_v36 = vld [vmem:[%s4942_s1 + $0x98] sm:$0xff]  ;;  %v222_v54 = vrot.slane %v3212_v33, 2  ;;  %v540_v33 = vld [vmem:[%s4942_s1 + $0x10] sm:$0xff] }
  0x43   :  { %2715 = vrot.lane.b32.xlu1 %v2714_v20, %s2917_s11  ;;  %2720 = vrot.lane.b32.xlu0 %v2719_v51, %s2917_s11  ;;  %v2729_v20 = vpack.i.bf16 %v3352_v58, %v3299_v16  ;;  %v560_v51 = vld [vmem:[%s4942_s1 + $0xb0] sm:$0xff] }
  0x44   :  { %2240 = vmatprep.subr.mxu0 %v562_v13  ;;  %v3428_v13 = vsel %vm168_vm2, %v211_v31, %v212_v32  ;;  %2308 = vmatprep.subr.mxu1 %v600_v60  ;;  %v542_v31 = vld [vmem:[%s4942_s1 + $0x20] sm:$0xff]  ;;  %v599_v32 = vld [vmem:[%s4942_s1 + $0x1e8] sm:$0xff]  ;;  %v224_v60 = vrot.slane %v3204_v28, 2 }
  0x45   :  { %2241 = vmatpush3.msra.mxu0 %v546_v19  ;;  %4968 = vst [vmem:[#allocation11_spill] sm:$0xff] %v3428_v13  ;;  %v543_v19 = vld [vmem:[%s4942_s1 + $0x28] sm:$0xff]  ;;  %2309 = vmatpush3.msra.mxu1 %v584_v6  ;;  %v598_v6 = vld [vmem:[%s4942_s1 + $0x1e0] sm:$0xff] }
  0x46   :  { %2242 = vmatprep.subr.mxu0 %v561_v21  ;;  %v3436_v21 = vsel %vm168_vm2, %v214_v43, %v215_v49  ;;  %v583_v43 = vld [vmem:[%s4942_s1 + $0x168] sm:$0xff]  ;;  %2310 = vmatprep.subr.mxu1 %v599_v32  ;;  %v230_v32 = vrot.slane %v3219_v38, 2 }
  0x47   :  { %2725 = vrot.lane.b32.xlu1 %v2724_v56, %s2917_s11  ;;  %v544_v56 = vld [vmem:[%s4942_s1 + $0x30] sm:$0xff]  ;;  %2730 = vrot.lane.b32.xlu0 %v2729_v20, %s2917_s11  ;;  %v3433_v20 = vld [vmem:[#allocation2 + $0x120] sm:$0xff]  ;;  %4969 = vst [vmem:[#allocation12_spill] sm:$0xff] %v3436_v21 }
  0x48   :  { %2243 = vmatpush3.msra.mxu0 %v545_v35  ;;  %v2749_v35 = vpack.i.bf16 %v3428_v13, %v3371_v14  ;;  %v2754_v49 = vpack.i.bf16 %v3436_v21, %v3433_v20  ;;  %2311 = vmatpush3.msra.mxu1 %v583_v43 }
  0x49   :  { %2244 = vmatprep.subr.mxu0 %v560_v51  ;;  %v221_v51 = vrot.slane %v3200_v25, 2  ;;  %2312 = vmatprep.subr.mxu1 %v598_v6 }
  0x4a   :  { %2245 = vmatpush3.msra.mxu0 %v544_v56  ;;  %v541_v56 = vld [vmem:[%s4942_s1 + $0x18] sm:$0xff] }
  0x4b   :  { %2735 = vrot.lane.b32.xlu1 %v2734_v24, %s2917_s11  ;;  %v558_v24 = vld [vmem:[%s4942_s1 + $0xa0] sm:$0xff]  ;;  %2246 = vmatprep.subr.mxu0 %v559_v63  ;;  %v556_v63 = vld [vmem:[%s4942_s1 + $0x90] sm:$0xff] }
  0x4c   :  { %2740 = vrot.lane.b32.xlu0 %v2739_v61, %s2917_s11  ;;  %2247 = vmatpush3.msra.mxu0 %v543_v19  ;;  %v225_v61 = vrot.slane %v3206_v29, 2  ;;  %v227_v29 = vrot.slane %v3208_v30, 2  ;;  %v555_v19 = vld [vmem:[%s4942_s1 + $0x88] sm:$0xff] }
  0x4d   :  { %2248 = vmatprep.subr.mxu0 %v558_v24  ;;  %v582_v24 = vld [vmem:[%s4942_s1 + $0x160] sm:$0xff] }
  0x4e   :  { %2249 = vmatpush3.msra.mxu0 %v542_v31  ;;  %v3486_v31 = vsel %vm217_vm3, %v221_v51, %v222_v54  ;;  %v3496_v43 = vsel %vm217_vm3, %v224_v60, %v225_v61 }
  0x4f   :  { %2745 = vrot.lane.b32.xlu1 %v2744_v8, %s2917_s11  ;;  %2250 = vmatprep.subr.mxu0 %v557_v36  ;;  %v228_v8 = vrot.slane %v3217_v37, 2  ;;  %v3490_v36 = vld [vmem:[#allocation2 + $0x90] sm:$0xff]  ;;  %v539_v37 = vld [vmem:[%s4942_s1 + $0x8] sm:$0xff] }
  0x50   :  { %2750 = vrot.lane.b32.xlu0 %v2749_v35, %s2917_s11  ;;  %2251 = vmatpush3.msra.mxu0 %v541_v56  ;;  %v231_v35 = vrot.slane %v3229_v44, 2  ;;  %v113_v56 = vld [vmem:[#allocation2 + $0x88] sm:$0x3] }
  0x51   :  { %2252 = vmatprep.subr.mxu0 %v556_v63 }
  0x52   :  { %2253 = vmatpush3.msra.mxu0 %v540_v33 }
  0x53   :  { %2755 = vrot.lane.b32.xlu1 %v2754_v49, %s2917_s11  ;;  %v554_v49 = vld [vmem:[%s4942_s1 + $0x80] sm:$0xff] }
  0x54   :  { %10 = vsyncpa [#allocation5], 0  ;;  %v233_v44 = vrot.slane %v3222_v40, 2  ;;  %v234_v51 = vrot.slane %v3232_v46, 2  ;;  %v3503_v54 = vld [vmem:[#allocation2 + $0x98] sm:$0x3]  ;;  %2254 = vmatprep.subr.mxu0 %v555_v19  ;;  %2313 = vmatpush3.msra.mxu1 %v582_v24  ;;  %v3514_v63 = vsel %vm217_vm3, %v227_v29, %v228_v8  ;;  %v3530_v29 = vsel %vm217_vm3, %v230_v32, %v231_v35 }
  0x55   :  { %4970 = vst [vmem:[#allocation13_spill] sm:$0xff] %v3503_v54  ;;  %v538_v60 = vld [vmem:[%s4942_s1] sm:$0xff]  ;;  %v597_v61 = vld [vmem:[%s4942_s1 + $0x1d8] sm:$0xff]  ;;  %426 = vrot.lane.b32.xlu0 %v3486_v31, %s2917_s11  ;;  %v236_v46 = vrot.slane %v3240_v50, 2  ;;  %v237_v33 = vrot.slane %v3243_v52, 2  ;;  %v239_v6 = vrot.slane %v3245_v53, 2  ;;  %2255 = vmatpush3.msra.mxu0 %v539_v37 }
  0x56   :  { %v3522_v19 = vld [vmem:[%s4942_s1 + $0x238] sm:$0xff]  ;;  %v240_v52 = vrot.slane %v3254_v57, 2  ;;  %v286_v8 = vrot.slane %v3288_v10, 1  ;;  %v287_v37 = vrot.slane %v113_v56, 1  ;;  %2256 = vmatprep.subr.mxu0 %v554_v49  ;;  %v596_v21 = vld [vmem:[%s4942_s1 + $0x1d0] sm:$0xff]  ;;  %v308_v13 = vrot.slane %v3288_v10, 2  ;;  %2314 = vmatprep.subr.mxu1 %v597_v61 }
  0x57   :  { %v581_v24 = vld [vmem:[%s4942_s1 + $0x158] sm:$0xff]  ;;  %428 = vrot.lane.b32.xlu1 %v3496_v43, %s2917_s11  ;;  %v309_v41 = vrot.slane %v113_v56, 2  ;;  %v318_v26 = vrot.slane %v3490_v36, 1  ;;  %v319_v0 = vrot.slane %v3503_v54, 1  ;;  %2257 = vmatpush3.msra.mxu0 %v538_v60  ;;  %v580_v57 = vld [vmem:[%s4942_s1 + $0x150] sm:$0xff]  ;;  %v595_v32 = vld [vmem:[%s4942_s1 + $0x1c8] sm:$0xff]  ;;  %v3555_v56 = vsel %vm217_vm3, %v233_v44, %v234_v51 }
  0x58   :  { %2594 = vmatprep.subr.mxu0 %v3522_v19  ;;  %2315 = vmatpush3.msra.mxu1 %v581_v24  ;;  %v579_v35 = vld [vmem:[%s4942_s1 + $0x148] sm:$0xff]  ;;  %v3558_v49 = vsel %vm217_vm3, %v239_v6, %v240_v52  ;;  %v3561_v60 = vsel %vm168_vm2, %v286_v8, %v287_v37  ;;  %v3567_v61 = vsel %vm217_vm3, %v236_v46, %v237_v33  ;;  %v578_v51 = vld [vmem:[%s4942_s1 + $0x140] sm:$0xff]  ;;  %v593_v6 = vld [vmem:[%s4942_s1 + $0x1b8] sm:$0xff]  ;;  %v248_v52 = vrot.slane %v3293_v12, 2 }
  0x59   :  { %430 = vrot.lane.b32.xlu0 %v3514_v63, %s2917_s11  ;;  %2316 = vmatprep.subr.mxu1 %v596_v21  ;;  %v594_v21 = vld [vmem:[%s4942_s1 + $0x1c0] sm:$0xff]  ;;  %v3570_v24 = vsel %vm217_vm3, %v308_v13, %v309_v41  ;;  %v320_v44 = vsel %vm168_vm2, %v318_v26, %v319_v0  ;;  %v2759_v46 = vpack.i.bf16 %v3558_v49, %v3561_v60  ;;  %v577_v0 = vld [vmem:[%s4942_s1 + $0x138] sm:$0xff]  ;;  %v245_v41 = vrot.slane %v3273_v3, 2  ;;  %v592_v33 = vld [vmem:[%s4942_s1 + $0x1b0] sm:$0xff] }
  0x5a   :  { %2317 = vmatpush3.msra.mxu1 %v580_v57  ;;  %4971 = vst [vmem:[#allocation14_spill] sm:$0xff] %v3570_v24  ;;  %v2764_v26 = vpack.i.bf16 %v3570_v24, %v320_v44  ;;  %v246_v13 = vrot.slane %v3275_v4, 2  ;;  %v249_v8 = vrot.slane %v3297_v15, 2  ;;  %v576_v37 = vld [vmem:[%s4942_s1 + $0x130] sm:$0xff]  ;;  %v591_v57 = vld [vmem:[%s4942_s1 + $0x1a8] sm:$0xff]  ;;  %v251_v4 = vrot.slane %v3299_v16, 2 }
  0x5b   :  { %432 = vrot.lane.b32.xlu1 %v3530_v29, %s2917_s11  ;;  %2318 = vmatprep.subr.mxu1 %v595_v32  ;;  %v252_v32 = vrot.slane %v3301_v17, 2  ;;  %v575_v15 = vld [vmem:[%s4942_s1 + $0x128] sm:$0xff]  ;;  %v255_v44 = vrot.slane %v3328_v39, 2  ;;  %v3627_v39 = vld [vmem:[#allocation2 + $0x138] sm:$0x3]  ;;  %vm2159_vm4 = vcmask 261120  }
  0x5c   :  { %2319 = vmatpush3.msra.mxu1 %v579_v35  ;;  %v3610_v35 = vsel %vm217_vm3, %v245_v41, %v246_v13  ;;  %v3618_v17 = vsel %vm217_vm3, %v248_v52, %v249_v8  ;;  %v3625_v41 = vld [vmem:[#allocation2 + $0x130] sm:$0xff]  ;;  %4972 = vst [vmem:[#allocation15_spill] sm:$0xff] %v3627_v39  ;;  %v589_v13 = vld [vmem:[%s4942_s1 + $0x198] sm:$0xff]  ;;  %v260_v52 = vrot.slane %v3362_v5, 2  ;;  %v261_v8 = vrot.slane %v3366_v9, 2 }
  0x5d   :  { %434 = vrot.lane.b32.xlu0 %v3555_v56, %s2917_s11  ;;  %2320 = vmatprep.subr.mxu1 %v594_v21  ;;  %v254_v21 = vrot.slane %v3315_v27, 2  ;;  %v588_v9 = vld [vmem:[%s4942_s1 + $0x190] sm:$0xff]  ;;  %v321_v54 = vrot.slane %v3625_v41, 1  ;;  %v322_v58 = vrot.slane %v3627_v39, 1 }
  0x5e   :  { %2321 = vmatpush3.msra.mxu1 %v578_v51  ;;  %v590_v51 = vld [vmem:[%s4942_s1 + $0x1a0] sm:$0xff] }
  0x5f   :  { %436 = vrot.lane.b32.xlu1 %v3567_v61, %s2917_s11  ;;  %2322 = vmatprep.subr.mxu1 %v593_v6  ;;  %v133_v6 = vld [vmem:[#allocation2 + $0x128] sm:$0x3] }
  0x60   :  { %2323 = vmatpush3.msra.mxu1 %v577_v0  ;;  %v257_v0 = vrot.slane %v3336_v45, 2  ;;  %v312_v24 = vrot.slane %v133_v6, 2 }
  0x61   :  { %2760 = vrot.lane.b32.xlu0 %v2759_v46, %s2917_s11  ;;  %2324 = vmatprep.subr.mxu1 %v592_v33  ;;  %v574_v46 = vld [vmem:[%s4942_s1 + $0x120] sm:$0xff]  ;;  %v3635_v33 = vsel %vm217_vm3, %v251_v4, %v252_v32  ;;  %v264_v4 = vrot.slane %v3373_v18, 2  ;;  %v289_v32 = vrot.slane %v3433_v20, 1  ;;  %v572_v18 = vld [vmem:[%s4942_s1 + $0x110] sm:$0xff] }
  0x62   :  { %2325 = vmatpush3.msra.mxu1 %v576_v37  ;;  %v573_v37 = vld [vmem:[%s4942_s1 + $0x118] sm:$0xff] }
  0x63   :  { %2765 = vrot.lane.b32.xlu1 %v2764_v26, %s2917_s11  ;;  %2326 = vmatprep.subr.mxu1 %v591_v57  ;;  %v258_v26 = vrot.slane %v3338_v47, 2  ;;  %v263_v47 = vrot.slane %v3371_v14, 2  ;;  %v3646_v57 = vsel %vm217_vm3, %v254_v21, %v255_v44  ;;  %v587_v21 = vld [vmem:[%s4942_s1 + $0x188] sm:$0xff] }
  0x64   :  { %2327 = vmatpush3.msra.mxu1 %v575_v15  ;;  %v290_v15 = vrot.slane %v133_v6, 1  ;;  %v571_v44 = vld [vmem:[%s4942_s1 + $0x108] sm:$0xff] }
  0x65   :  { %442 = vrot.lane.b32.xlu0 %v3610_v35, %s2917_s11  ;;  %2328 = vmatprep.subr.mxu1 %v590_v51  ;;  %v311_v51 = vrot.slane %v3433_v20, 2  ;;  %v3670_v6 = vsel %vm217_vm3, %v257_v0, %v258_v26  ;;  %v323_v0 = vsel %vm168_vm2, %v321_v54, %v322_v58  ;;  %v570_v26 = vld [vmem:[%s4942_s1 + $0x100] sm:$0xff]  ;;  %v218_v58 = vrot.slane %v3193_v22, 2 }
  0x66   :  { %2329 = vmatpush3.msra.mxu1 %v574_v46  ;;  %v3673_v46 = vsel %vm217_vm3, %v263_v47, %v264_v4  ;;  %v219_v54 = vrot.slane %v3195_v23, 2  ;;  %v608_v23 = vld [vmem:[%s4942_s1 + $0x230] sm:$0xff] }
  0x67   :  { %444 = vrot.lane.b32.xlu1 %v3618_v17, %s2917_s11  ;;  %2330 = vmatprep.subr.mxu1 %v589_v13  ;;  %v3676_v13 = vsel %vm168_vm2, %v289_v32, %v290_v15  ;;  %v3685_v39 = vsel %vm217_vm3, %v311_v51, %v312_v24 }
  0x68   :  { %2331 = vmatpush3.msra.mxu1 %v573_v37  ;;  %v586_v37 = vld [vmem:[%s4942_s1 + $0x180] sm:$0xff]  ;;  %v2769_v47 = vpack.i.bf16 %v3673_v46, %v3676_v13  ;;  %v2774_v24 = vpack.i.bf16 %v3685_v39, %v323_v0 }
  0x69   :  { %446 = vrot.lane.b32.xlu0 %v3635_v33, %s2917_s11  ;;  %2332 = vmatprep.subr.mxu1 %v588_v9  ;;  %v3682_v9 = vsel %vm217_vm3, %v260_v52, %v261_v8  ;;  %v220_v8 = vsel %vm217_vm3, %v218_v58, %v219_v54 }
  0x6a   :  { %2333 = vmatpush3.msra.mxu1 %v572_v18 }
  0x6b   :  { %448 = vrot.lane.b32.xlu1 %v3646_v57, %s2917_s11  ;;  %2334 = vmatprep.subr.mxu1 %v587_v21 }
  0x6c   :  { %2335 = vmatpush3.msra.mxu1 %v571_v44 }
  0x6d   :  { %450 = vrot.lane.b32.xlu0 %v3670_v6, %s2917_s11  ;;  %2336 = vmatprep.subr.mxu1 %v586_v37 }
  0x6e   :  { %2337 = vmatpush3.msra.mxu1 %v570_v26 }
  0x6f   :  { %452 = vrot.lane.b32.xlu1 %v3682_v9, %s2917_s11 }
  0x71   :  { %2770 = vrot.lane.b32.xlu0 %v2769_v47, %s2917_s11 }
  0x73   :  { %2775 = vrot.lane.b32.xlu1 %v2774_v24, %s2917_s11 }
  0xa5   :  { %v2681_v52 = vpop.permute.xlu0 %2680 }
  0xa6   :  { %v2683_v4 = vunpack.i.h.bf16 %v2681_v52  ;;  %v2682_v32 = vunpack.i.l.bf16 %v2681_v52 }
  0xa8   :  { %v502_v21 = vsel %vm21_vm0, %v220_v8, %v2682_v32  ;;  %v486_v44 = vsel %vm21_vm0, %v3193_v22, %v2683_v4  ;;  %v607_v22 = vld [vmem:[%s4942_s1 + $0x228] sm:$0xff] }
  0xa9   :  { %v2691_v15 = vpop.permute.xlu1 %2690  ;;  %v2686_v37 = vpop.permute.xlu0 %2685  ;;  %713 = vmatprep.mubr.f32.mxu0 %v502_v21 }
  0xaa   :  { %v2693_v51 = vunpack.i.h.bf16 %v2691_v15  ;;  %v2692_v18 = vunpack.i.l.bf16 %v2691_v15  ;;  %v2688_v26 = vunpack.i.h.bf16 %v2686_v37  ;;  %v2687_v47 = vunpack.i.l.bf16 %v2686_v37  ;;  %714 = vmatmul.mubr.f32.vlgmr.msra.gmra.mxu0 %v486_v44 }
  0xab   :  { %2595 = vmatpush3.msra.mxu0 %v3522_v19  ;;  %v606_v19 = vld [vmem:[%s4942_s1 + $0x220] sm:$0xff] }
  0xac   :  { %v488_v0 = vsel %vm21_vm0, %v3204_v28, %v2693_v51  ;;  %v503_v54 = vsel %vm21_vm0, %v3486_v31, %v2687_v47  ;;  %v487_v28 = vsel %vm21_vm0, %v3200_v25, %v2688_v26  ;;  %v504_v52 = vsel %vm21_vm0, %v3496_v43, %v2692_v18  ;;  %2596 = vmatprep.subr.mxu0 %v608_v23  ;;  %v605_v25 = vld [vmem:[%s4942_s1 + $0x218] sm:$0xff]  ;;  %v604_v18 = vld [vmem:[%s4942_s1 + $0x210] sm:$0xff] }
  0xad   :  { %v2696_v24 = vpop.permute.xlu1 %2695  ;;  %858 = vmatprep.mubr.f32.mxu1 %v488_v0  ;;  %v2701_v8 = vpop.permute.xlu0 %2700  ;;  %718 = vmatprep.mubr.f32.mxu0 %v503_v54 }
  0xae   :  { %v2697_v58 = vunpack.i.l.bf16 %v2696_v24  ;;  %2597 = vmatpush3.msra.mxu0 %v608_v23  ;;  %v2698_v32 = vunpack.i.h.bf16 %v2696_v24  ;;  %v2702_v31 = vunpack.i.l.bf16 %v2701_v8  ;;  %v2703_v44 = vunpack.i.h.bf16 %v2701_v8  ;;  %v603_v23 = vld [vmem:[%s4942_s1 + $0x208] sm:$0xff] }
  0xaf   :  { %719 = vmatmul.mubr.f32.gmra.mxu0 %v487_v28  ;;  %2598 = vmatprep.subr.mxu0 %v607_v22 }
  0xb0   :  { %723 = vmatprep.mubr.f32.mxu0 %v504_v52  ;;  %2599 = vmatpush3.msra.mxu0 %v607_v22  ;;  %v505_v15 = vsel %vm21_vm0, %v3514_v63, %v2697_v58  ;;  %v489_v37 = vsel %vm21_vm0, %v3208_v30, %v2698_v32  ;;  %v506_v47 = vsel %vm21_vm0, %v3530_v29, %v2702_v31  ;;  %v242_v31 = vrot.slane %v3269_v1, 2 }
  0xb1   :  { %v2706_v4 = vpop.permute.xlu1 %2705  ;;  %2600 = vmatprep.subr.mxu0 %v606_v19  ;;  %v2711_v51 = vpop.permute.xlu0 %2710  ;;  %v490_v58 = vsel %vm21_vm0, %v3219_v38, %v2703_v44 }
  0xb2   :  { %2601 = vmatpush3.msra.mxu0 %v606_v19  ;;  %v2707_v26 = vunpack.i.l.bf16 %v2706_v4  ;;  %v2708_v30 = vunpack.i.h.bf16 %v2706_v4  ;;  %v2712_v54 = vunpack.i.l.bf16 %v2711_v51  ;;  %v2713_v19 = vunpack.i.h.bf16 %v2711_v51 }
  0xb3   :  { %724 = vmatmul.mubr.f32.gmra.mxu0 %v488_v0  ;;  %2602 = vmatprep.subr.mxu0 %v605_v25  ;;  %v602_v0 = vld [vmem:[%s4942_s1 + $0x200] sm:$0xff] }
  0xb4   :  { %728 = vmatprep.mubr.f32.mxu0 %v505_v15  ;;  %2603 = vmatpush3.msra.mxu0 %v605_v25  ;;  %v507_v28 = vsel %vm21_vm0, %v3555_v56, %v2707_v26  ;;  %v491_v4 = vsel %vm21_vm0, %v3222_v40, %v2708_v30  ;;  %v508_v38 = vsel %vm21_vm0, %v3567_v61, %v2712_v54  ;;  %v243_v15 = vrot.slane %v3271_v2, 2 }
  0xb5   :  { %v2716_v21 = vpop.permute.xlu1 %2715  ;;  %2604 = vmatprep.subr.mxu0 %v604_v18  ;;  %v2721_v24 = vpop.permute.xlu0 %2720  ;;  %v492_v51 = vsel %vm21_vm0, %v3240_v50, %v2713_v19 }
  0xb6   :  { %2605 = vmatpush3.msra.mxu0 %v604_v18  ;;  %v2717_v32 = vunpack.i.l.bf16 %v2716_v21  ;;  %v2718_v44 = vunpack.i.h.bf16 %v2716_v21  ;;  %v2723_v2 = vunpack.i.h.bf16 %v2721_v24 }
  0xb7   :  { %729 = vmatmul.mubr.f32.gmra.mxu0 %v489_v37  ;;  %2606 = vmatprep.subr.mxu0 %v603_v23 }
  0xb8   :  { %733 = vmatprep.mubr.f32.mxu0 %v506_v47  ;;  %2607 = vmatpush3.msra.mxu0 %v603_v23  ;;  %v2722_v23 = vunpack.i.l.bf16 %v2721_v24  ;;  %v509_v40 = vsel %vm21_vm0, %v3558_v49, %v2717_v32  ;;  %v244_v47 = vsel %vm217_vm3, %v242_v31, %v243_v15  ;;  %v493_v21 = vsel %vm21_vm0, %v3245_v53, %v2718_v44 }
  0xb9   :  { %v2726_v22 = vpop.permute.xlu1 %2725  ;;  %2608 = vmatprep.subr.mxu0 %v602_v0  ;;  %v2731_v52 = vpop.permute.xlu0 %2730 }
  0xba   :  { %2609 = vmatpush3.msra.mxu0 %v602_v0  ;;  %v2727_v30 = vunpack.i.l.bf16 %v2726_v22  ;;  %v510_v54 = vsel %vm21_vm0, %v244_v47, %v2722_v23  ;;  %v2728_v32 = vunpack.i.h.bf16 %v2726_v22  ;;  %v2732_v24 = vunpack.i.l.bf16 %v2731_v52 }
  0xbb   :  { %734 = vmatmul.mubr.f32.gmra.mxu0 %v490_v58  ;;  %v2733_v44 = vunpack.i.h.bf16 %v2731_v52 }
  0xbc   :  { %738 = vmatprep.mubr.f32.mxu0 %v507_v28  ;;  %v511_v31 = vsel %vm21_vm0, %v3610_v35, %v2727_v30 }
  0xbd   :  { %v3746_v8 = vpop.permute.xlu1 %2735  ;;  %v496_v52 = vsel %vm21_vm0, %v3293_v12, %v2733_v44 }
  0xbe   :  { %v3752_v25 = vpop.permute.xlu0 %2740  ;;  %v2737_v22 = vunpack.i.l.bf16 %v3746_v8  ;;  %v2738_v35 = vunpack.i.h.bf16 %v3746_v8 }
  0xbf   :  { %739 = vmatmul.mubr.f32.gmra.mxu0 %v491_v4 }
  0xc0   :  { %743 = vmatprep.mubr.f32.mxu0 %v508_v38  ;;  %v494_v38 = vsel %vm21_vm0, %v3269_v1, %v2723_v2  ;;  %v2743_v2 = vunpack.i.h.bf16 %v3752_v25  ;;  %v497_v8 = vsel %vm21_vm0, %v3299_v16, %v2738_v35 }
  0xc1   :  { %v3756_v18 = vpop.permute.xlu1 %2745 }
  0xc2   :  { %v3762_v26 = vpop.permute.xlu0 %2750  ;;  %v2747_v12 = vunpack.i.l.bf16 %v3756_v18 }
  0xc3   :  { %744 = vmatmul.mubr.f32.gmra.mxu0 %v492_v51  ;;  %v2752_v16 = vunpack.i.l.bf16 %v3762_v26 }
  0xc4   :  { %748 = vmatprep.mubr.f32.mxu0 %v509_v40 }
  0xc5   :  { %v3765_v0 = vpop.permute.xlu1 %2755 }
  0xc7   :  { %v427_v50 = vpop.permute.xlu0 %426  ;;  %749 = vmatmul.mubr.f32.gmra.mxu0 %v493_v21 }
  0xc8   :  { %v518_v28 = vsel %vm21_vm0, %v3237_v48, %v427_v50  ;;  %753 = vmatprep.mubr.f32.mxu0 %v510_v54  ;;  %v495_v48 = vsel %vm21_vm0, %v3273_v3, %v2728_v32  ;;  %v2742_v3 = vunpack.i.l.bf16 %v3752_v25  ;;  %v2748_v50 = vunpack.i.h.bf16 %v3756_v18 }
  0xc9   :  { %v429_v19 = vpop.permute.xlu1 %428  ;;  %859 = vmatmul.mubr.f32.vlgmr.msra.gmra.mxu1 %v518_v28  ;;  %v498_v25 = vsel %vm21_vm0, %v3315_v27, %v2743_v2  ;;  %v515_v28 = vsel %vm21_vm0, %v3670_v6, %v2747_v12  ;;  %v2753_v18 = vunpack.i.h.bf16 %v3762_v26  ;;  %v2758_v26 = vunpack.i.h.bf16 %v3765_v0  ;;  %v4980_v12 = vld [vmem:[#allocation12_spill] sm:$0xff] }
  0xca   :  { %863 = vmatprep.mubr.f32.mxu1 %v489_v37  ;;  %v519_v53 = vsel %vm21_vm0, %v3226_v42, %v429_v19  ;;  %v512_v42 = vsel %vm21_vm0, %v3618_v17, %v2732_v24  ;;  %v499_v27 = vsel %vm21_vm0, %v3336_v45, %v2748_v50  ;;  %v516_v24 = vsel %vm21_vm0, %v3682_v9, %v2752_v16  ;;  %v1627_v50 = vld [vmem:[%s4944_s3 + $0xf0] sm:$0xff]  ;;  %v1626_v16 = vld [vmem:[%s4944_s3 + $0xe8] sm:$0xff] }
  0xcb   :  { %v431_v15 = vpop.permute.xlu0 %430  ;;  %754 = vmatmul.mubr.f32.gmra.mxu0 %v494_v38  ;;  %v500_v45 = vsel %vm21_vm0, %v3362_v5, %v2753_v18  ;;  %v4973_v5 = vld [vmem:[#allocation7_spill] sm:$0xff]  ;;  %v1624_v18 = vld [vmem:[%s4944_s3 + $0xd8] sm:$0xff] }
  0xcc   :  { %758 = vmatprep.mubr.f32.mxu0 %v511_v31  ;;  %v520_v1 = vsel %vm21_vm0, %v3251_v55, %v431_v15  ;;  %v513_v55 = vsel %vm21_vm0, %v3635_v33, %v2737_v22  ;;  %v501_v15 = vsel %vm21_vm0, %v3371_v14, %v2758_v26  ;;  %v1622_v26 = vld [vmem:[%s4944_s3 + $0xc8] sm:$0xff] }
  0xcd   :  { %864 = vmatmul.mubr.f32.gmra.mxu1 %v519_v53  ;;  %v433_v37 = vpop.permute.xlu1 %432 }
  0xce   :  { %868 = vmatprep.mubr.f32.mxu1 %v490_v58  ;;  %v521_v58 = vsel %vm21_vm0, %v3260_v59, %v433_v37  ;;  %v514_v59 = vsel %vm21_vm0, %v3646_v57, %v2742_v3 }
  0xcf   :  { %v435_v23 = vpop.permute.xlu0 %434  ;;  %759 = vmatmul.mubr.f32.gmra.mxu0 %v495_v48 }
  0xd0   :  { %763 = vmatprep.mubr.f32.mxu0 %v512_v42  ;;  %v4976_v42 = vld [vmem:[#allocation9_spill] sm:$0xff] }
  0xd1   :  { %869 = vmatmul.mubr.f32.gmra.mxu1 %v520_v1  ;;  %v437_v40 = vpop.permute.xlu1 %436 }
  0xd2   :  { %873 = vmatprep.mubr.f32.mxu1 %v491_v4  ;;  %v522_v4 = vsel %vm21_vm0, %v3265_v62, %v435_v23  ;;  %v523_v62 = vsel %vm21_vm0, %v3284_v7, %v437_v40 }
  0xd3   :  { %764 = vmatmul.mubr.f32.gmra.mxu0 %v496_v52  ;;  %v2761_v47 = vpop.permute.xlu0 %2760 }
  0xd4   :  { %768 = vmatprep.mubr.f32.mxu0 %v513_v55  ;;  %v2762_v30 = vunpack.i.l.bf16 %v2761_v47  ;;  %v4979_v55 = vld [vmem:[#allocation11_spill] sm:$0xff] }
  0xd5   :  { %874 = vmatmul.mubr.f32.gmra.mxu1 %v521_v58  ;;  %v2766_v54 = vpop.permute.xlu1 %2765 }
  0xd6   :  { %878 = vmatprep.mubr.f32.mxu1 %v492_v51  ;;  %v2763_v51 = vunpack.i.h.bf16 %v2761_v47  ;;  %v2767_v19 = vunpack.i.l.bf16 %v2766_v54  ;;  %v534_v32 = vsel %vm21_vm0, %v3288_v10, %v2762_v30  ;;  %v2768_v38 = vunpack.i.h.bf16 %v2766_v54 }
  0xd7   :  { %769 = vmatmul.mubr.f32.gmra.mxu0 %v497_v8  ;;  %v443_v31 = vpop.permute.xlu0 %442 }
  0xd8   :  { %773 = vmatprep.mubr.f32.mxu0 %v514_v59  ;;  %v524_v7 = vsel %vm21_vm0, %v3291_v11, %v2763_v51  ;;  %v535_v10 = vsel %vm21_vm0, %v3490_v36, %v2767_v19  ;;  %v525_v53 = vsel %vm21_vm0, %v3561_v60, %v2768_v38  ;;  %v1623_v38 = vld [vmem:[%s4944_s3 + $0xd0] sm:$0xff] }
  0xd9   :  { %879 = vmatmul.mubr.f32.gmra.mxu1 %v522_v4  ;;  %v445_v44 = vpop.permute.xlu1 %444 }
  0xda   :  { %883 = vmatprep.mubr.f32.mxu1 %v493_v21  ;;  %v2757_v21 = vunpack.i.l.bf16 %v3765_v0  ;;  %v526_v0 = vsel %vm21_vm0, %v3324_v34, %v443_v31  ;;  %v527_v60 = vsel %vm21_vm0, %v4973_v5, %v445_v44  ;;  %v4974_v34 = vld [vmem:[#allocation8_spill] sm:$0xff]  ;;  %v1621_v44 = vld [vmem:[%s4944_s3 + $0xc0] sm:$0xff] }
  0xdb   :  { %774 = vmatmul.mubr.f32.gmra.mxu0 %v498_v25  ;;  %v447_v48 = vpop.permute.xlu0 %446  ;;  %v1606_v31 = vld [vmem:[%s4944_s3 + $0x48] sm:$0xff] }
  0xdc   :  { %778 = vmatprep.mubr.f32.mxu0 %v515_v28  ;;  %v517_v11 = vsel %vm21_vm0, %v3673_v46, %v2757_v21  ;;  %v528_v14 = vsel %vm21_vm0, %v4974_v34, %v447_v48  ;;  %v1625_v28 = vld [vmem:[%s4944_s3 + $0xe0] sm:$0xff]  ;;  %v1608_v21 = vld [vmem:[%s4944_s3 + $0x58] sm:$0xff]  ;;  %v1642_v5 = vld [vmem:[%s4944_s3 + $0x168] sm:$0xff] }
  0xdd   :  { %884 = vmatmul.mubr.f32.gmra.mxu1 %v523_v62  ;;  %v449_v22 = vpop.permute.xlu1 %448  ;;  %v1610_v62 = vld [vmem:[%s4944_s3 + $0x68] sm:$0xff]  ;;  %v1605_v48 = vld [vmem:[%s4944_s3 + $0x40] sm:$0xff] }
  0xde   :  { %888 = vmatprep.mubr.f32.mxu1 %v534_v32  ;;  %v1609_v32 = vld [vmem:[%s4944_s3 + $0x60] sm:$0xff] }
  0xdf   :  { %779 = vmatmul.mubr.f32.gmra.mxu0 %v499_v27  ;;  %v451_v1 = vpop.permute.xlu0 %450  ;;  %v1657_v34 = vld [vmem:[%s4944_s3 + $0x1e0] sm:$0xff] }
  0xe0   :  { %783 = vmatprep.mubr.f32.mxu0 %v516_v24  ;;  %v1607_v24 = vld [vmem:[%s4944_s3 + $0x50] sm:$0xff] }
  0xe1   :  { %889 = vmatmul.mubr.f32.gmra.mxu1 %v524_v7  ;;  %v453_v23 = vpop.permute.xlu1 %452 }
  0xe2   :  { %893 = vmatprep.mubr.f32.mxu1 %v535_v10  ;;  %v531_v40 = vsel %vm21_vm0, %v4979_v55, %v453_v23  ;;  %v1660_v10 = vld [vmem:[%s4944_s3 + $0x1f8] sm:$0xff]  ;;  %v1603_v23 = vld [vmem:[%s4944_s3 + $0x30] sm:$0xff]  ;;  %v1601_v55 = vld [vmem:[%s4944_s3 + $0x20] sm:$0xff] }
  0xe3   :  { %784 = vmatmul.mubr.f32.gmra.mxu0 %v500_v45  ;;  %v2771_v35 = vpop.permute.xlu0 %2770  ;;  %2490 = vmatprep.subr.mxu0 %v1660_v10 }
  0xe4   :  { %788 = vmatprep.mubr.f32.mxu0 %v517_v11  ;;  %v2772_v3 = vunpack.i.l.bf16 %v2771_v35 }
  0xe5   :  { %894 = vmatmul.mubr.f32.gmra.mxu1 %v525_v53  ;;  %v2776_v58 = vpop.permute.xlu1 %2775  ;;  %v1659_v53 = vld [vmem:[%s4944_s3 + $0x1f0] sm:$0xff] }
  0xe6   :  { %898 = vmatprep.mubr.f32.mxu1 %v496_v52  ;;  %v4977_v52 = vld [vmem:[#allocation14_spill] sm:$0xff]  ;;  %v2777_v47 = vunpack.i.l.bf16 %v2776_v58  ;;  %v536_v2 = vsel %vm21_vm0, %v3433_v20, %v2772_v3  ;;  %v327_v20 = vrot.slane %v3625_v41, 2  ;;  %v1654_v3 = vld [vmem:[%s4944_s3 + $0x1c8] sm:$0xff] }
  0xe7   :  { %789 = vmatmul.mubr.f32.gmra.mxu0 %v501_v15 }
  0xe8   :  { %2610 = vmatprep.mubr.msk.f32.mxu0 %vm21_vm0, %v3496_v43  ;;  %v324_v43 = vrot.slane %v3490_v36, 2  ;;  %v537_v4 = vsel %vm21_vm0, %v3625_v41, %v2777_v47  ;;  %v1616_v47 = vld [vmem:[%s4944_s3 + $0x98] sm:$0xff] }
  0xe9   :  { %899 = vmatmul.mubr.f32.gmra.mxu1 %v526_v0  ;;  %v1658_v0 = vld [vmem:[%s4944_s3 + $0x1e8] sm:$0xff] }
  0xea   :  { %903 = vmatprep.mubr.f32.mxu1 %v497_v8  ;;  %v2778_v8 = vunpack.i.h.bf16 %v2776_v58  ;;  %v1617_v58 = vld [vmem:[%s4944_s3 + $0xa0] sm:$0xff] }
  0xeb   :  { %2611 = vmatmul.mubr.msk.f32.vlgmr.msra.gmra.mxu0 %vm21_vm0, %v3514_v63  ;;  %v4975_v63 = vld [vmem:[#allocation13_spill] sm:$0xff] }
  0xec   :  { %2613 = vmatprep.mubr.msk.f32.mxu0 %vm21_vm0, %v3530_v29  ;;  %v325_v37 = vrot.slane %v4975_v63, 2  ;;  %v529_v29 = vsel %vm21_vm0, %v4976_v42, %v449_v22  ;;  %v1641_v22 = vld [vmem:[%s4944_s3 + $0x160] sm:$0xff]  ;;  %v1656_v63 = vld [vmem:[%s4944_s3 + $0x1d8] sm:$0xff] }
  0xed   :  { %904 = vmatmul.mubr.f32.gmra.mxu1 %v527_v60  ;;  %v1640_v42 = vld [vmem:[%s4944_s3 + $0x158] sm:$0xff] }
  0xee   :  { %908 = vmatprep.mubr.f32.mxu1 %v498_v25  ;;  %v1611_v25 = vld [vmem:[%s4944_s3 + $0x70] sm:$0xff] }
  0xef   :  { %2614 = vmatmul.mubr.msk.f32.gmra.mxu0 %vm21_vm0, %v3555_v56  ;;  %v326_v56 = vsel %vm217_vm3, %v324_v43, %v325_v37  ;;  %v1604_v43 = vld [vmem:[%s4944_s3 + $0x38] sm:$0xff]  ;;  %v1619_v37 = vld [vmem:[%s4944_s3 + $0xb0] sm:$0xff] }
  0xf0   :  { %2616 = vmatprep.mubr.msk.f32.mxu0 %vm21_vm0, %v3567_v61  ;;  %v4978_v61 = vld [vmem:[#allocation10_spill] sm:$0xff] }
  0xf1   :  { %909 = vmatmul.mubr.f32.gmra.mxu1 %v528_v14  ;;  %v530_v36 = vsel %vm21_vm0, %v4978_v61, %v451_v1  ;;  %v1620_v14 = vld [vmem:[%s4944_s3 + $0xb8] sm:$0xff] }
  0xf2   :  { %913 = vmatprep.mubr.f32.mxu1 %v499_v27 }
  0xf3   :  { %2617 = vmatmul.mubr.msk.f32.gmra.mxu0 %vm21_vm0, %v3558_v49  ;;  %v2773_v49 = vunpack.i.h.bf16 %v2771_v35  ;;  %v1655_v35 = vld [vmem:[%s4944_s3 + $0x1d0] sm:$0xff] }
  0xf4   :  { %2619 = vmatprep.mubr.msk.f32.mxu0 %vm21_vm0, %v4977_v52  ;;  %v1618_v52 = vld [vmem:[%s4944_s3 + $0xa8] sm:$0xff] }
  0xf5   :  { %914 = vmatmul.mubr.f32.gmra.mxu1 %v529_v29 }
  0xf6   :  { %918 = vmatprep.mubr.f32.mxu1 %v500_v45  ;;  %v1644_v45 = vld [vmem:[%s4944_s3 + $0x178] sm:$0xff] }
  0xf7   :  { %2620 = vmatmul.mubr.msk.f32.gmra.mxu0 %vm21_vm0, %v326_v56  ;;  %v1639_v56 = vld [vmem:[%s4944_s3 + $0x150] sm:$0xff] }
  0xf8   :  { %2622 = vmatprep.mubr.msk.f32.mxu0 %vm21_vm0, %v3618_v17  ;;  %v532_v17 = vsel %vm21_vm0, %v4980_v12, %v2773_v49  ;;  %2491 = vmatpush3.msra.mxu0 %v1644_v45 }
  0xf9   :  { %919 = vmatmul.mubr.f32.gmra.mxu1 %v530_v36  ;;  %2492 = vmatprep.subr.mxu0 %v1659_v53  ;;  %v1602_v36 = vld [vmem:[%s4944_s3 + $0x28] sm:$0xff] }
  0xfa   :  { %923 = vmatprep.mubr.f32.mxu1 %v501_v15  ;;  %v1643_v15 = vld [vmem:[%s4944_s3 + $0x170] sm:$0xff] }
  0xfb   :  { %2623 = vmatmul.mubr.msk.f32.gmra.mxu0 %vm21_vm0, %v3635_v33  ;;  %v4981_v33 = vld [vmem:[#allocation15_spill] sm:$0xff] }
  0xfc   :  { %2625 = vmatprep.mubr.msk.f32.mxu0 %vm21_vm0, %v3646_v57  ;;  %v328_v59 = vrot.slane %v4981_v33, 2  ;;  %v533_v57 = vsel %vm21_vm0, %v3676_v13, %v2778_v8  ;;  %v1628_v13 = vld [vmem:[%s4944_s3 + $0xf8] sm:$0xff]  ;;  %2493 = vmatpush3.msra.mxu0 %v1643_v15 }
  0xfd   :  { %924 = vmatmul.mubr.f32.gmra.mxu1 %v531_v40  ;;  %2410 = vmatprep.subr.mxu1 %v1628_v13  ;;  %v1600_v8 = vld [vmem:[%s4944_s3 + $0x18] sm:$0xff] }
  0xfe   :  { %928 = vmatprep.mubr.f32.mxu1 %v536_v2  ;;  %2494 = vmatprep.subr.mxu0 %v1658_v0 }
  0xff   :  { %2626 = vmatmul.mubr.msk.f32.gmra.mxu0 %vm21_vm0, %v3670_v6  ;;  %v329_v6 = vsel %vm217_vm3, %v327_v20, %v328_v59  ;;  %v1599_v20 = vld [vmem:[%s4944_s3 + $0x10] sm:$0xff]  ;;  %v1614_v59 = vld [vmem:[%s4944_s3 + $0x88] sm:$0xff] }
 0x100   :  { %2628 = vmatprep.mubr.msk.f32.mxu0 %vm21_vm0, %v3682_v9  ;;  %2495 = vmatpush3.msra.mxu0 %v1642_v5 }
 0x101   :  { %929 = vmatmul.mubr.f32.gmra.mxu1 %v532_v17  ;;  %2496 = vmatprep.subr.mxu0 %v1657_v34  ;;  %v1615_v17 = vld [vmem:[%s4944_s3 + $0x90] sm:$0xff] }
 0x102   :  { %933 = vmatprep.mubr.f32.mxu1 %v537_v4  ;;  %2497 = vmatpush3.msra.mxu0 %v1641_v22 }
 0x103   :  { %2629 = vmatmul.mubr.msk.f32.gmra.mxu0 %vm21_vm0, %v3673_v46  ;;  %v1612_v46 = vld [vmem:[%s4944_s3 + $0x78] sm:$0xff]  ;;  %2498 = vmatprep.subr.mxu0 %v1656_v63 }
 0x104   :  { %2631 = vmatprep.mubr.msk.f32.mxu0 %vm21_vm0, %v3685_v39  ;;  %2411 = vmatpush3.msra.mxu1 %v1612_v46  ;;  %v1613_v46 = vld [vmem:[%s4944_s3 + $0x80] sm:$0xff] }
 0x105   :  { %934 = vmatmul.mubr.f32.gmra.mxu1 %v533_v57  ;;  %2412 = vmatprep.subr.mxu1 %v1627_v50 }
 0x106   :  { %2413 = vmatpush3.msra.mxu1 %v1611_v25  ;;  %2499 = vmatpush3.msra.mxu0 %v1640_v42 }
 0x107   :  { %2632 = vmatmul.mubr.msk.f32.gmra.mxu0 %vm21_vm0, %v329_v6  ;;  %2414 = vmatprep.subr.mxu1 %v1626_v16  ;;  %v1598_v6 = vld [vmem:[%s4944_s3 + $0x8] sm:$0xff] }
 0x108   :  { %2415 = vmatpush3.msra.mxu1 %v1610_v62  ;;  %2500 = vmatprep.subr.mxu0 %v1655_v35  ;;  %v4090_v35 = vld [vmem:[#allocation3 + $0x8] sm:$0x3] }
 0x109   :  { %2416 = vmatprep.subr.mxu1 %v1625_v28  ;;  %2501 = vmatpush3.msra.mxu0 %v1639_v56 }
 0x10a   :  { %2417 = vmatpush3.msra.mxu1 %v1609_v32  ;;  %2502 = vmatprep.subr.mxu0 %v1654_v3 }
 0x10b   :  { %2418 = vmatprep.subr.mxu1 %v1624_v18 }
 0x10c   :  { %2419 = vmatpush3.msra.mxu1 %v1608_v21 }
 0x10d   :  { %2420 = vmatprep.subr.mxu1 %v1623_v38 }
 0x10e   :  { %2421 = vmatpush3.msra.mxu1 %v1607_v24 }
 0x10f   :  { %2422 = vmatprep.subr.mxu1 %v1622_v26 }
 0x110   :  { %2423 = vmatpush3.msra.mxu1 %v1606_v31 }
 0x111   :  { %2424 = vmatprep.subr.mxu1 %v1621_v44 }
 0x112   :  { %2425 = vmatpush3.msra.mxu1 %v1605_v48 }
 0x113   :  { %2426 = vmatprep.subr.mxu1 %v1620_v14 }
 0x114   :  { %2427 = vmatpush3.msra.mxu1 %v1604_v43 }
 0x115   :  { %2428 = vmatprep.subr.mxu1 %v1619_v37 }
 0x116   :  { %2429 = vmatpush3.msra.mxu1 %v1603_v23  ;;  %v4088_v23 = vld [vmem:[#allocation3] sm:$0xff] }
 0x117   :  { %2430 = vmatprep.subr.mxu1 %v1618_v52  ;;  %v4095_v52 = vld [vmem:[%s4943_s2] ss:$0 sm:$0xff] }
 0x118   :  { %2431 = vmatpush3.msra.mxu1 %v1602_v36 }
 0x119   :  { %2432 = vmatprep.subr.mxu1 %v1617_v58  ;;  %v1229_v58 = vrot.slane %v4088_v23, 1 }
 0x11a   :  { %2433 = vmatpush3.msra.mxu1 %v1601_v55  ;;  %v1230_v55 = vrot.slane %v4090_v35, 1 }
 0x11b   :  { %2434 = vmatprep.subr.mxu1 %v1616_v47 }
 0x11c   :  { %2435 = vmatpush3.msra.mxu1 %v1600_v8 }
 0x11d   :  { %2436 = vmatprep.subr.mxu1 %v1615_v17  ;;  %v4113_v17 = vld [vmem:[#allocation3 + $0xa0] sm:$0xff] }
 0x11e   :  { %2437 = vmatpush3.msra.mxu1 %v1599_v20 }
 0x11f   :  { %2438 = vmatprep.subr.mxu1 %v1614_v59 }
 0x120   :  { %2439 = vmatpush3.msra.mxu1 %v1598_v6 }
 0x121   :  { %2440 = vmatprep.subr.mxu1 %v1613_v46 }
 0x16a   :  { %v3886_v9 = vpop.f32.mrf.mxu0 }
 0x16c   :  { %v3888_v41 = vpop.f32.mrf.mxu0 }
 0x16d   :  { %v2260_v63 = vadd.f32 %v3888_v41, %v3886_v9 }
 0x16f   :  { %v3890_v30 = vpop.f32.mrf.mxu0  ;;  %v716_v47 = vadd.f32 %v2260_v63, %v4095_v52 }
 0x171   :  { %v3898_v54 = vpop.f32.mrf.mxu0 }
 0x172   :  { %v2263_v14 = vadd.f32 %v3898_v54, %v3890_v30 }
 0x173   :  { %v3900_v39 = vpop.f32.mrf.mxu0 }
 0x174   :  { %v721_v56 = vadd.f32 %v2263_v14, %v4095_v52  ;;  %v1253_v14 = vrot.slane %v4113_v17, 1 }
 0x175   :  { %v3911_v51 = vpop.f32.mrf.mxu0 }
 0x176   :  { %v2266_v41 = vadd.f32 %v3911_v51, %v3900_v39 }
 0x177   :  { %v3919_v19 = vpop.f32.mrf.mxu0 }
 0x178   :  { %v726_v46 = vadd.f32 %v2266_v41, %v4095_v52 }
 0x179   :  { %v3927_v27 = vpop.f32.mrf.mxu0 }
 0x17a   :  { %v2269_v30 = vadd.f32 %v3927_v27, %v3919_v19 }
 0x17b   :  { %v3935_v7 = vpop.f32.mrf.mxu0 }
 0x17d   :  { %v3952_v11 = vpop.f32.mrf.mxu0 }
 0x17f   :  { %v3969_v60 = vpop.f32.mrf.mxu0 }
 0x181   :  { %v3983_v1 = vpop.f32.mrf.mxu0 }
 0x182   :  { %v2275_v51 = vadd.f32 %v3983_v1, %v3969_v60 }
 0x183   :  { %v3997_v29 = vpop.f32.mrf.mxu0 }
 0x184   :  { %v741_v41 = vadd.f32 %v2275_v51, %v4095_v52 }
 0x185   :  { %v4011_v61 = vpop.f32.mrf.mxu0 }
 0x187   :  { %v4022_v49 = vpop.f32.mrf.mxu0 }
 0x189   :  { %v2338_v40 = vpop.f32.mrf.mxu1  ;;  %v4030_v2 = vpop.f32.mrf.mxu0 }
 0x18b   :  { %v2339_v12 = vpop.f32.mrf.mxu1  ;;  %v4038_v4 = vpop.f32.mrf.mxu0 }
 0x18c   :  { %v2340_v36 = vadd.f32 %v2339_v12, %v2338_v40  ;;  %v731_v40 = vadd.f32 %v2269_v30, %v4095_v52  ;;  %v2272_v12 = vadd.f32 %v3952_v11, %v3935_v7 }
 0x18d   :  { %v2341_v33 = vpop.f32.mrf.mxu1  ;;  %v4046_v57 = vpop.f32.mrf.mxu0 }
 0x18e   :  { %v861_v6 = vadd.f32 %v2340_v36, %v716_v47  ;;  %v736_v1 = vadd.f32 %v2272_v12, %v4095_v52  ;;  %v1597_v36 = vld [vmem:[%s4944_s3] sm:$0xff]  ;;  %v2284_v47 = vadd.f32 %v4046_v57, %v4038_v4 }
 0x18f   :  { %v2342_v13 = vpop.f32.mrf.mxu1  ;;  %v4054_v50 = vpop.f32.mrf.mxu0  ;;  %2441 = vmatpush3.msra.mxu1 %v1597_v36 }
 0x190   :  { %v2343_v37 = vadd.f32 %v2342_v13, %v2341_v33  ;;  %v4122_v13 = vld [vmem:[#allocation3 + $0xa8] sm:$0x3] }
 0x191   :  { %v2344_v25 = vpop.f32.mrf.mxu1  ;;  %v4056_v16 = vpop.f32.mrf.mxu0 }
 0x192   :  { %v866_v27 = vadd.f32 %v2343_v37, %v721_v56  ;;  %v1254_v56 = vrot.slane %v4122_v13, 1 }
 0x193   :  { %v2345_v62 = vpop.f32.mrf.mxu1  ;;  %v4058_v28 = vpop.f32.mrf.mxu0 }
 0x194   :  { %v2346_v20 = vadd.f32 %v2345_v62, %v2344_v25  ;;  %v2281_v25 = vadd.f32 %v4030_v2, %v4022_v49 }
 0x195   :  { %v2347_v32 = vpop.f32.mrf.mxu1  ;;  %v4060_v18 = vpop.f32.mrf.mxu0 }
 0x197   :  { %v2348_v21 = vpop.f32.mrf.mxu1  ;;  %v4062_v38 = vpop.f32.mrf.mxu0 }
 0x198   :  { %v2349_v8 = vadd.f32 %v2348_v21, %v2347_v32  ;;  %v4126_v21 = vsel %vm168_vm2, %v1229_v58, %v1230_v55  ;;  %v1637_v58 = vld [vmem:[%s4944_s3 + $0x140] sm:$0xff]  ;;  %v2278_v55 = vadd.f32 %v4011_v61, %v3997_v29  ;;  %v751_v61 = vadd.f32 %v2281_v25, %v4095_v52 }
 0x199   :  { %v2350_v24 = vpop.f32.mrf.mxu1  ;;  %v4064_v10 = vpop.f32.mrf.mxu0 }
 0x19a   :  { %v876_v60 = vadd.f32 %v2349_v8, %v731_v40  ;;  %v2287_v8 = vadd.f32 %v4056_v16, %v4054_v50  ;;  %v2293_v4 = vadd.f32 %v4064_v10, %v4062_v38 }
 0x19b   :  { %v2351_v26 = vpop.f32.mrf.mxu1  ;;  %v4066_v45 = vpop.f32.mrf.mxu0 }
 0x19c   :  { %v2352_v62 = vadd.f32 %v2351_v26, %v2350_v24  ;;  %v871_v26 = vadd.f32 %v2346_v20, %v726_v46 }
 0x19d   :  { %v2353_v53 = vpop.f32.mrf.mxu1  ;;  %v4068_v31 = vpop.f32.mrf.mxu0 }
 0x19e   :  { %v2296_v57 = vadd.f32 %v4068_v31, %v4066_v45  ;;  %v881_v16 = vadd.f32 %v2352_v62, %v736_v1  ;;  %v771_v1 = vadd.f32 %v2293_v4, %v4095_v52 }
 0x19f   :  { %v2354_v15 = vpop.f32.mrf.mxu1  ;;  %v4070_v0 = vpop.f32.mrf.mxu0 }
 0x1a0   :  { %v2355_v7 = vadd.f32 %v2354_v15, %v2353_v53  ;;  %v1638_v53 = vld [vmem:[%s4944_s3 + $0x148] sm:$0xff]  ;;  %v1653_v15 = vld [vmem:[%s4944_s3 + $0x1c0] sm:$0xff]  ;;  %v4199_v25 = vadd.f32 %v2296_v57, %v4095_v52 }
 0x1a1   :  { %v4072_v44 = vpop.f32.mrf.mxu1  ;;  %v4074_v5 = vpop.f32.mrf.mxu0  ;;  %2503 = vmatpush3.msra.mxu0 %v1638_v53  ;;  %v1650_v53 = vld [vmem:[%s4944_s3 + $0x1a8] sm:$0xff] }
 0x1a2   :  { %2504 = vmatprep.subr.mxu0 %v1653_v15  ;;  %v886_v29 = vadd.f32 %v2355_v7, %v741_v41  ;;  %v2299_v38 = vadd.f32 %v4074_v5, %v4070_v0  ;;  %v746_v0 = vadd.f32 %v2278_v55, %v4095_v52  ;;  %v761_v5 = vadd.f32 %v2287_v8, %v4095_v52 }
 0x1a3   :  { %v4076_v48 = vpop.f32.mrf.mxu1  ;;  %v4078_v34 = vpop.f32.mrf.mxu0  ;;  %2505 = vmatpush3.msra.mxu0 %v1637_v58 }
 0x1a4   :  { %v2358_v10 = vadd.f32 %v4076_v48, %v4072_v44  ;;  %v756_v44 = vadd.f32 %v2284_v47, %v4095_v52  ;;  %v4213_v15 = vadd.f32 %v2299_v38, %v4095_v52 }
 0x1a5   :  { %v4082_v22 = vpop.f32.mrf.mxu1  ;;  %v4084_v43 = vpop.f32.mrf.mxu0 }
 0x1a7   :  { %v2360_v42 = vpop.f32.mrf.mxu1  ;;  %v4099_v54 = vpop.f32.mrf.mxu0 }
 0x1a8   :  { %v2361_v12 = vadd.f32 %v2360_v42, %v4082_v22  ;;  %v1636_v22 = vld [vmem:[%s4944_s3 + $0x138] sm:$0xff] }
 0x1a9   :  { %v4102_v9 = vpop.f32.mrf.mxu1  ;;  %v4106_v3 = vpop.f32.mrf.mxu0 }
 0x1ab   :  { %v4111_v19 = vpop.f32.mrf.mxu1  ;;  %v2612_v39 = vpop.f32.mrf.mxu0 }
 0x1ac   :  { %v1011_v33 = vadd.f32 %v2612_v39, %v866_v27  ;;  %v2290_v27 = vadd.f32 %v4060_v18, %v4058_v28  ;;  %v1652_v28 = vld [vmem:[%s4944_s3 + $0x1b8] sm:$0xff] }
 0x1ad   :  { %v4120_v59 = vpop.f32.mrf.mxu1  ;;  %v1005_v32 = vpop.f32.mrf.mxu0  ;;  %v4172_v18 = vld [vmem:[%s4944_s3 + $0x238] sm:$0xff]  ;;  %2506 = vmatprep.subr.mxu0 %v1652_v28 }
 0x1ae   :  { %v1085_v11 = vmax.f32 %v1011_v33, 0.0  ;;  %v1006_v63 = vadd.f32 %v1005_v32, %v861_v6  ;;  %2634 = vmatprep.subr.mxu1 %v4172_v18  ;;  %v1651_v33 = vld [vmem:[%s4944_s3 + $0x1b0] sm:$0xff]  ;;  %2507 = vmatpush3.msra.mxu0 %v1636_v22  ;;  %v4194_v32 = vadd.f32 %v2290_v27, %v4095_v52 }
 0x1af   :  { %v2366_v37 = vpop.f32.mrf.mxu1  ;;  %v2615_v30 = vpop.f32.mrf.mxu0  ;;  %v1635_v6 = vld [vmem:[%s4944_s3 + $0x130] sm:$0xff]  ;;  %2508 = vmatprep.subr.mxu0 %v1651_v33 }
 0x1b0   :  { %1142 = vst.msk [vmem:[#allocation3 + $0x21] sm:$0xff] %vm21_vm0, %v1085_v11  ;;  %v1084_v49 = vmax.f32 %v1006_v63, 0.0  ;;  %v1021_v2 = vadd.f32 %v2615_v30, %v876_v60  ;;  %v2367_v48 = vadd.f32 %v2366_v37, %v4120_v59  ;;  %v896_v60 = vadd.f32 %v2361_v12, %v751_v61  ;;  %2509 = vmatpush3.msra.mxu0 %v1635_v6  ;;  %v1647_v33 = vld [vmem:[%s4944_s3 + $0x190] sm:$0xff] }
 0x1b1   :  { %v4144_v24 = vpop.f32.mrf.mxu1  ;;  %v1015_v40 = vpop.f32.mrf.mxu0  ;;  %v2302_v59 = vadd.f32 %v4084_v43, %v4078_v34  ;;  %v2364_v37 = vadd.f32 %v4111_v19, %v4102_v9  ;;  %v891_v9 = vadd.f32 %v2358_v10, %v746_v0  ;;  %2510 = vmatprep.subr.mxu0 %v1650_v53  ;;  %v1634_v19 = vld [vmem:[%s4944_s3 + $0x128] sm:$0xff]  ;;  %v4262_v6 = vadd.f32 %v4106_v3, %v4099_v54 }
 0x1b2   :  { %1141 = vst.msk [vmem:[#allocation3 + $0x11] sm:$0xff] %vm21_vm0, %v1084_v49  ;;  %v1087_v39 = vmax.f32 %v1021_v2, 0.0  ;;  %v1016_v51 = vadd.f32 %v1015_v40, %v871_v26  ;;  %v1649_v49 = vld [vmem:[%s4944_s3 + $0x1a0] sm:$0xff]  ;;  %v906_v55 = vadd.f32 %v2367_v48, %v761_v5  ;;  %2511 = vmatpush3.msra.mxu0 %v1634_v19  ;;  %v1646_v19 = vld [vmem:[%s4944_s3 + $0x188] sm:$0xff] }
 0x1b3   :  { %v4159_v20 = vpop.f32.mrf.mxu1  ;;  %v2618_v50 = vpop.f32.mrf.mxu0  ;;  %v1633_v2 = vld [vmem:[%s4944_s3 + $0x120] sm:$0xff]  ;;  %2512 = vmatprep.subr.mxu0 %v1649_v49  ;;  %v4238_v4 = vadd.f32 %v2302_v59, %v4095_v52 }
 0x1b4   :  { %1144 = vst.msk [vmem:[#allocation3 + $0x41] sm:$0xff] %vm21_vm0, %v1087_v39  ;;  %v1086_v45 = vmax.f32 %v1016_v51, 0.0  ;;  %v1031_v31 = vadd.f32 %v2618_v50, %v886_v29  ;;  %v2370_v57 = vadd.f32 %v4159_v20, %v4144_v24  ;;  %2513 = vmatpush3.msra.mxu0 %v1633_v2 }
 0x1b5   :  { %v2371_v42 = vpop.f32.mrf.mxu1  ;;  %v1025_v46 = vpop.f32.mrf.mxu0 }
 0x1b6   :  { %1143 = vst.msk [vmem:[#allocation3 + $0x31] sm:$0xff] %vm21_vm0, %v1086_v45  ;;  %v1089_v7 = vmax.f32 %v1031_v31, 0.0  ;;  %v1026_v11 = vadd.f32 %v1025_v46, %v881_v16  ;;  %v901_v16 = vadd.f32 %v2364_v37, %v756_v44 }
 0x1b7   :  { %v2372_v63 = vpop.f32.mrf.mxu1  ;;  %v2621_v62 = vpop.f32.mrf.mxu0  ;;  %v4205_v30 = vld [vmem:[#allocation3 + $0x20] sm:$0xff]  ;;  %v4207_v36 = vld [vmem:[#allocation3 + $0x28] sm:$0x3] }
 0x1b8   :  { %1146 = vst.msk [vmem:[#allocation3 + $0x61] sm:$0xff] %vm21_vm0, %v1089_v7  ;;  %v1088_v41 = vmax.f32 %v1026_v11, 0.0  ;;  %v1041_v34 = vadd.f32 %v2621_v62, %v896_v60  ;;  %v2373_v26 = vadd.f32 %v2372_v63, %v2371_v42  ;;  %v1235_v27 = vrot.slane %v4205_v30, 1  ;;  %v1632_v42 = vld [vmem:[%s4944_s3 + $0x118] sm:$0xff]  ;;  %v1631_v11 = vld [vmem:[%s4944_s3 + $0x110] sm:$0xff] }
 0x1b9   :  { %v4216_v43 = vpop.f32.mrf.mxu1  ;;  %v1035_v58 = vpop.f32.mrf.mxu0  ;;  %v4227_v47 = vld [vmem:[#allocation3 + $0x10] sm:$0xff]  ;;  %v4229_v8 = vld [vmem:[#allocation3 + $0x18] sm:$0x3]  ;;  %v1236_v40 = vrot.slane %v4207_v36, 1  ;;  %v911_v62 = vadd.f32 %v2370_v57, %v4194_v32 }
 0x1ba   :  { %1145 = vst.msk [vmem:[#allocation3 + $0x51] sm:$0xff] %vm21_vm0, %v1088_v41  ;;  %v1091_v12 = vmax.f32 %v1041_v34, 0.0  ;;  %v1036_v39 = vadd.f32 %v1035_v58, %v891_v9  ;;  %v2779_v29 = vpack.i.bf16 %v4126_v21, %v4227_v47  ;;  %v1232_v61 = vrot.slane %v4227_v47, 1  ;;  %v1648_v21 = vld [vmem:[%s4944_s3 + $0x198] sm:$0xff] }
 0x1bb   :  { %v2375_v51 = vpop.f32.mrf.mxu1  ;;  %v2624_v50 = vpop.f32.mrf.mxu0  ;;  %v1233_v28 = vrot.slane %v4229_v8, 1  ;;  %v4243_v22 = vld [vmem:[#allocation3 + $0x40] sm:$0xff]  ;;  %v4245_v38 = vld [vmem:[#allocation3 + $0x48] sm:$0x3]  ;;  %2514 = vmatprep.subr.mxu0 %v1648_v21  ;;  %v916_v44 = vadd.f32 %v2373_v26, %v771_v1  ;;  %v4270_v46 = vsel %vm168_vm2, %v1235_v27, %v1236_v40 }
 0x1bc   :  { %1148 = vst.msk [vmem:[#allocation3 + $0x81] sm:$0xff] %vm21_vm0, %v1091_v12  ;;  %v1090_v10 = vmax.f32 %v1036_v39, 0.0  ;;  %v1051_v45 = vadd.f32 %v2624_v50, %v906_v55  ;;  %2780 = vrot.lane.b32.xlu0 %v2779_v29, %s2917_s11  ;;  %v1241_v24 = vrot.slane %v4243_v22, 1  ;;  %v1242_v20 = vrot.slane %v4245_v38, 1  ;;  %2515 = vmatpush3.msra.mxu0 %v1632_v42  ;;  %v1630_v55 = vld [vmem:[%s4944_s3 + $0x108] sm:$0xff]  ;;  %v1629_v21 = vld [vmem:[%s4944_s3 + $0x100] sm:$0xff] }
 0x1bd   :  { %v2377_v31 = vpop.f32.mrf.mxu1  ;;  %v1045_v0 = vpop.f32.mrf.mxu0  ;;  %v4265_v5 = vsel %vm168_vm2, %v1232_v61, %v1233_v28  ;;  %v4267_v48 = vld [vmem:[#allocation3 + $0x30] sm:$0xff]  ;;  %v4272_v7 = vld [vmem:[#allocation3 + $0x38] sm:$0x3]  ;;  %2516 = vmatprep.subr.mxu0 %v1647_v33  ;;  %v2376_v49 = vadd.f32 %v2375_v51, %v4216_v43  ;;  %v1645_v43 = vld [vmem:[%s4944_s3 + $0x180] sm:$0xff] }
 0x1be   :  { %1147 = vst.msk [vmem:[#allocation3 + $0x71] sm:$0xff] %vm21_vm0, %v1090_v10  ;;  %v1093_v54 = vmax.f32 %v1051_v45, 0.0  ;;  %v1046_v3 = vadd.f32 %v1045_v0, %v901_v16  ;;  %v2784_v60 = vpack.i.bf16 %v4265_v5, %v4205_v30  ;;  %v2789_v1 = vpack.i.bf16 %v4270_v46, %v4267_v48  ;;  %2517 = vmatpush3.msra.mxu0 %v1631_v11 }
 0x1bf   :  { %v2378_v63 = vpop.f32.mrf.mxu1  ;;  %v2627_v37 = vpop.f32.mrf.mxu0  ;;  %v1238_v53 = vrot.slane %v4267_v48, 1  ;;  %v1239_v41 = vrot.slane %v4272_v7, 1  ;;  %v4285_v34 = vld [vmem:[#allocation3 + $0x60] sm:$0xff]  ;;  %v4287_v9 = vld [vmem:[#allocation3 + $0x68] sm:$0x3]  ;;  %v4297_v58 = vsel %vm168_vm2, %v1241_v24, %v1242_v20  ;;  %2518 = vmatprep.subr.mxu0 %v1646_v19  ;;  %v1283_v24 = vrot.slane %v4205_v30, 2 }
 0x1c0   :  { %v2379_v59 = vadd.f32 %v2378_v63, %v2377_v31  ;;  %1150 = vst.msk [vmem:[#allocation3 + $0xc1] sm:$0xff] %vm21_vm0, %v1093_v54  ;;  %v1092_v2 = vmax.f32 %v1046_v3, 0.0  ;;  %v1061_v26 = vadd.f32 %v2627_v37, %v916_v44  ;;  %2785 = vrot.lane.b32.xlu1 %v2784_v60, %s2917_s11  ;;  %2790 = vrot.lane.b32.xlu0 %v2789_v1, %s2917_s11  ;;  %v1247_v29 = vrot.slane %v4285_v34, 1 }
 0x1c1   :  { %v2380_v32 = vpop.f32.mrf.mxu1  ;;  %v1055_v27 = vpop.f32.mrf.mxu0  ;;  %v4307_v12 = vsel %vm168_vm2, %v1238_v53, %v1239_v41  ;;  %v4309_v39 = vld [vmem:[#allocation3 + $0x50] sm:$0xff]  ;;  %v4311_v51 = vld [vmem:[#allocation3 + $0x58] sm:$0x3]  ;;  %v1248_v61 = vrot.slane %v4287_v9, 1  ;;  %2519 = vmatpush3.msra.mxu0 %v1630_v55  ;;  %v1284_v20 = vrot.slane %v4207_v36, 2  ;;  %v921_v11 = vadd.f32 %v2376_v49, %v4199_v25 }
 0x1c2   :  { %v926_v40 = vadd.f32 %v2379_v59, %v4213_v15  ;;  %1149 = vst.msk [vmem:[#allocation3 + $0xb1] sm:$0xff] %vm21_vm0, %v1092_v2  ;;  %v1095_v57 = vmax.f32 %v1061_v26, 0.0  ;;  %v1056_v50 = vadd.f32 %v1055_v27, %v911_v62  ;;  %v2794_v15 = vpack.i.bf16 %v4307_v12, %v4243_v22  ;;  %2520 = vmatprep.subr.mxu0 %v1645_v43 }
 0x1c3   :  { %v2381_v16 = vpop.f32.mrf.mxu1  ;;  %v2799_v28 = vpack.i.bf16 %v4297_v58, %v4309_v39  ;;  %v2630_v10 = vpop.f32.mrf.mxu0  ;;  %v1244_v45 = vrot.slane %v4309_v39, 1  ;;  %v1245_v31 = vrot.slane %v4311_v51, 1  ;;  %v4337_v36 = vsel %vm168_vm2, %v1247_v29, %v1248_v61  ;;  %2521 = vmatpush3.msra.mxu0 %v1629_v21  ;;  %v4365_v29 = vld [vmem:[#allocation3 + $0x80] sm:$0xff] }
 0x1c4   :  { %1152 = vst.msk [vmem:[#allocation3 + $0xe1] sm:$0xff] %vm21_vm0, %v1095_v57  ;;  %v1094_v42 = vmax.f32 %v1056_v50, 0.0  ;;  %v2382_v33 = vadd.f32 %v2381_v16, %v2380_v32  ;;  %v1071_v0 = vadd.f32 %v2630_v10, %v926_v40  ;;  %2795 = vrot.lane.b32.xlu1 %v2794_v15, %s2917_s11  ;;  %v1280_v1 = vrot.slane %v4227_v47, 2 }
 0x1c5   :  { %v2383_v44 = vpop.f32.mrf.mxu1  ;;  %2800 = vrot.lane.b32.xlu0 %v2799_v28, %s2917_s11  ;;  %v1065_v54 = vpop.f32.mrf.mxu0  ;;  %v4332_v3 = vsel %vm168_vm2, %v1244_v45, %v1245_v31  ;;  %v4334_v63 = vld [vmem:[#allocation3 + $0x70] sm:$0xff]  ;;  %v4339_v60 = vld [vmem:[#allocation3 + $0x78] sm:$0x3]  ;;  %v1281_v59 = vrot.slane %v4229_v8, 2  ;;  %v791_v19 = vadd.f32 %v4262_v6, %v4095_v52  ;;  %v1255_v52 = vsel %vm168_vm2, %v1253_v14, %v1254_v56 }
 0x1c6   :  { %1151 = vst.msk [vmem:[#allocation3 + $0xd1] sm:$0xff] %vm21_vm0, %v1094_v42  ;;  %v1097_v37 = vmax.f32 %v1071_v0, 0.0  ;;  %v1066_v25 = vadd.f32 %v1065_v54, %v921_v11  ;;  %v2804_v53 = vpack.i.bf16 %v4332_v3, %v4285_v34  ;;  %v2809_v41 = vpack.i.bf16 %v4337_v36, %v4334_v63 }
 0x1c7   :  { %v2384_v62 = vpop.f32.mrf.mxu1  ;;  %v2633_v2 = vpop.f32.mrf.mxu0  ;;  %v1250_v26 = vrot.slane %v4334_v63, 1  ;;  %v1251_v8 = vrot.slane %v4339_v60, 1  ;;  %v931_v55 = vadd.f32 %v2382_v33, %v4238_v4  ;;  %v4361_v6 = vld [vmem:[#allocation3 + $0xc0] sm:$0xff]  ;;  %v4363_v43 = vld [vmem:[#allocation3 + $0xc8] sm:$0x3]  ;;  %v4373_v4 = vsel %vm217_vm3, %v1280_v1, %v1281_v59 }
 0x1c8   :  { %v2385_v49 = vadd.f32 %v2384_v62, %v2383_v44  ;;  %1154 = vst.msk [vmem:[#allocation3 + $0x101] sm:$0xff] %vm21_vm0, %v1097_v37  ;;  %v1096_v32 = vmax.f32 %v1066_v25, 0.0  ;;  %2805 = vrot.lane.b32.xlu1 %v2804_v53, %s2917_s11  ;;  %v4376_v50 = vsel %vm217_vm3, %v1283_v24, %v1284_v20  ;;  %v1259_v45 = vrot.slane %v4361_v6, 1 }
 0x1c9   :  { %2810 = vrot.lane.b32.xlu0 %v2809_v41, %s2917_s11  ;;  %v1075_v40 = vpop.f32.mrf.mxu0  ;;  %v4368_v61 = vsel %vm168_vm2, %v1250_v26, %v1251_v8  ;;  %v4370_v57 = vld [vmem:[#allocation3 + $0xb0] sm:$0xff]  ;;  %v4378_v14 = vld [vmem:[#allocation3 + $0xb8] sm:$0x3]  ;;  %v1260_v31 = vrot.slane %v4363_v43, 1  ;;  %v1286_v20 = vrot.slane %v4267_v48, 2  ;;  %v1287_v42 = vrot.slane %v4272_v7, 2 }
 0x1ca   :  { %v936_v27 = vadd.f32 %v2385_v49, %v791_v19  ;;  %1153 = vst.msk [vmem:[#allocation3 + $0xf1] sm:$0xff] %vm21_vm0, %v1096_v32  ;;  %v1076_v56 = vadd.f32 %v1075_v40, %v931_v55  ;;  %v2814_v16 = vpack.i.bf16 %v4368_v61, %v4365_v29  ;;  %v2819_v15 = vpack.i.bf16 %v4370_v57, %v4373_v4  ;;  %v1174_v32 = vld [vmem:[#allocation3 + $0x88] sm:$0x3]  ;;  %v4437_v40 = vld [vmem:[#allocation3 + $0x90] sm:$0xff] }
 0x1cb   :  { %v1256_v28 = vrot.slane %v4370_v57, 1  ;;  %v1257_v10 = vrot.slane %v4378_v14, 1  ;;  %v1289_v11 = vrot.slane %v4243_v22, 2  ;;  %v1290_v54 = vrot.slane %v4245_v38, 2  ;;  %v4414_v38 = vld [vmem:[#allocation3 + $0xe0] sm:$0xff] }
 0x1cc   :  { %v1081_v21 = vadd.f32 %v2633_v2, %v936_v27  ;;  %v1098_v24 = vmax.f32 %v1076_v56, 0.0  ;;  %2815 = vrot.lane.b32.xlu1 %v2814_v16, %s2917_s11  ;;  %v2824_v59 = vpack.i.bf16 %v4376_v50, %v1255_v52  ;;  %v4408_v7 = vsel %vm168_vm2, %v1259_v45, %v1260_v31  ;;  %v4418_v19 = vld [vmem:[#allocation3 + $0xe8] sm:$0x3]  ;;  %v4439_v56 = vld [vmem:[#allocation3 + $0x98] sm:$0x3] }
 0x1cd   :  { %2820 = vrot.lane.b32.xlu0 %v2819_v15, %s2917_s11  ;;  %v4394_v0 = vsel %vm168_vm2, %v1256_v28, %v1257_v10  ;;  %v4396_v44 = vld [vmem:[#allocation3 + $0xd0] sm:$0xff]  ;;  %v4400_v1 = vld [vmem:[#allocation3 + $0xd8] sm:$0x3]  ;;  %v1292_v53 = vrot.slane %v4309_v39, 2  ;;  %v1293_v41 = vrot.slane %v4311_v51, 2  ;;  %v4421_v49 = vsel %vm217_vm3, %v1286_v20, %v1287_v42  ;;  %4982 = vst [vmem:[#allocation7_spill] sm:$0xff] %v4439_v56 }
 0x1ce   :  { %v1099_v33 = vmax.f32 %v1081_v21, 0.0  ;;  %1155 = vst.msk [vmem:[#allocation3 + $0x111] sm:$0xff] %vm21_vm0, %v1098_v24  ;;  %v2829_v37 = vpack.i.bf16 %v4394_v0, %v4361_v6  ;;  %v1262_v25 = vrot.slane %v4396_v44, 1  ;;  %v1263_v62 = vrot.slane %v4400_v1, 1 }
 0x1cf   :  { %v4424_v2 = vsel %vm217_vm3, %v1289_v11, %v1290_v54  ;;  %v2834_v26 = vpack.i.bf16 %v4396_v44, %v4421_v49  ;;  %v1265_v51 = vrot.slane %v4414_v38, 1  ;;  %v1266_v27 = vrot.slane %v4418_v19, 1  ;;  %v4460_v11 = vld [vmem:[#allocation3 + $0x100] sm:$0xff] }
 0x1d0   :  { %1156 = vst.msk [vmem:[#allocation3 + $0x121] sm:$0xff] %vm21_vm0, %v1099_v33  ;;  %2825 = vrot.lane.b32.xlu1 %v2824_v59, %s2917_s11  ;;  %v2839_v8 = vpack.i.bf16 %v4424_v2, %v4408_v7  ;;  %v4431_v55 = vsel %vm168_vm2, %v1262_v25, %v1263_v62  ;;  %v4444_v16 = vsel %vm217_vm3, %v1292_v53, %v1293_v41  ;;  %v1295_v28 = vrot.slane %v4285_v34, 2 }
 0x1d1   :  { %2830 = vrot.lane.b32.xlu0 %v2829_v37, %s2917_s11  ;;  %v4433_v52 = vld [vmem:[#allocation3 + $0xf0] sm:$0xff]  ;;  %v4446_v15 = vld [vmem:[#allocation3 + $0xf8] sm:$0x3]  ;;  %v1296_v21 = vrot.slane %v4287_v9, 2  ;;  %v1345_v10 = vrot.slane %v4365_v29, 1  ;;  %v1346_v45 = vrot.slane %v1174_v32, 1  ;;  %v2844_v31 = vpack.i.bf16 %v4431_v55, %v4414_v38 }
 0x1d2   :  { %v2849_v24 = vpack.i.bf16 %v4433_v52, %v4444_v16  ;;  %v1377_v20 = vrot.slane %v4437_v40, 1  ;;  %v1378_v42 = vrot.slane %v4439_v56, 1  ;;  %v4458_v33 = vsel %vm168_vm2, %v1265_v51, %v1266_v27  ;;  %v4468_v37 = vld [vmem:[#allocation3 + $0x108] sm:$0x3] }
 0x1d3   :  { %v1268_v9 = vrot.slane %v4433_v52, 1  ;;  %v1269_v54 = vrot.slane %v4446_v15, 1  ;;  %v4473_v62 = vsel %vm217_vm3, %v1295_v28, %v1296_v21  ;;  %v4476_v53 = vsel %vm168_vm2, %v1345_v10, %v1346_v45 }
 0x1d4   :  { %2835 = vrot.lane.b32.xlu1 %v2834_v26, %s2917_s11  ;;  %v1298_v41 = vrot.slane %v4334_v63, 2  ;;  %v1299_v26 = vrot.slane %v4339_v60, 2  ;;  %v2859_v51 = vpack.i.bf16 %v4476_v53, %v4460_v11  ;;  %v1379_v27 = vsel %vm168_vm2, %v1377_v20, %v1378_v42 }
 0x1d5   :  { %2840 = vrot.lane.b32.xlu0 %v2839_v8, %s2917_s11  ;;  %v4466_v59 = vld [vmem:[#allocation3 + $0x110] sm:$0xff]  ;;  %v4470_v25 = vld [vmem:[#allocation3 + $0x118] sm:$0x3]  ;;  %v2854_v8 = vpack.i.bf16 %v4473_v62, %v4458_v33  ;;  %v4487_v28 = vsel %vm168_vm2, %v1268_v9, %v1269_v54  ;;  %v1272_v21 = vrot.slane %v4468_v37, 1  ;;  %v1368_v20 = vrot.slane %v1174_v32, 2 }
 0x1d6   :  { %v1274_v10 = vrot.slane %v4466_v59, 1  ;;  %v1275_v45 = vrot.slane %v4470_v25, 1  ;;  %v4495_v60 = vsel %vm217_vm3, %v1298_v41, %v1299_v26  ;;  %v2874_v9 = vpack.i.bf16 %v1379_v27, %v4466_v59 }
 0x1d7   :  { %v2864_v42 = vpack.i.bf16 %v4495_v60, %v4487_v28  ;;  %v4512_v26 = vld [vmem:[#allocation3 + $0x120] sm:$0xff]  ;;  %v1305_v27 = vrot.slane %v4378_v14, 2  ;;  %v1314_v14 = vrot.slane %v4418_v19, 2  ;;  %v1316_v19 = vrot.slane %v4433_v52, 2 }
 0x1d8   :  { %2845 = vrot.lane.b32.xlu1 %v2844_v31, %s2917_s11  ;;  %v1271_v31 = vrot.slane %v4460_v11, 1  ;;  %v4505_v56 = vsel %vm168_vm2, %v1274_v10, %v1275_v45  ;;  %v1310_v10 = vrot.slane %v4396_v44, 2  ;;  %v1311_v45 = vrot.slane %v4400_v1, 2  ;;  %v1194_v1 = vld [vmem:[#allocation3 + $0x128] sm:$0x3] }
 0x1d9   :  { %2850 = vrot.lane.b32.xlu0 %v2849_v24, %s2917_s11  ;;  %v1367_v24 = vrot.slane %v4365_v29, 2  ;;  %4984 = vst [vmem:[#allocation13_spill] sm:$0xff] %v4505_v56 }
 0x1da   :  { %v4502_v54 = vsel %vm168_vm2, %v1271_v31, %v1272_v21  ;;  %v1307_v31 = vrot.slane %v4361_v6, 2  ;;  %v1308_v21 = vrot.slane %v4363_v43, 2 }
 0x1db   :  { %4983 = vst [vmem:[#allocation8_spill] sm:$0xff] %v4502_v54  ;;  %v4510_v41 = vsel %vm217_vm3, %v1367_v24, %v1368_v20  ;;  %v4526_v24 = vld [vmem:[#allocation3 + $0x130] sm:$0xff]  ;;  %v4528_v20 = vld [vmem:[#allocation3 + $0x138] sm:$0x3] }
 0x1dc   :  { %2855 = vrot.lane.b32.xlu1 %v2854_v8, %s2917_s11  ;;  %4985 = vst [vmem:[#allocation9_spill] sm:$0xff] %v4510_v41  ;;  %v2869_v32 = vpack.i.bf16 %v4510_v41, %v4502_v54  ;;  %v2879_v8 = vpack.i.bf16 %v4505_v56, %v4512_v26  ;;  %4986 = vst [vmem:[#allocation14_spill] sm:$0xff] %v4526_v24  ;;  %v4536_v43 = vsel %vm217_vm3, %v1307_v31, %v1308_v21 }
 0x1dd   :  { %2860 = vrot.lane.b32.xlu0 %v2859_v51, %s2917_s11  ;;  %v1304_v51 = vrot.slane %v4370_v57, 2  ;;  %4987 = vst [vmem:[#allocation10_spill] sm:$0xff] %v4528_v20  ;;  %v4545_v41 = vsel %vm217_vm3, %v1310_v10, %v1311_v45  ;;  %v1320_v21 = vrot.slane %v4468_v37, 2  ;;  %v1322_v56 = vrot.slane %v4466_v59, 2 }
 0x1de   :  { %v1349_v54 = vrot.slane %v1194_v1, 1  ;;  %v1370_v10 = vrot.slane %v4512_v26, 2  ;;  %v1371_v45 = vrot.slane %v1194_v1, 2 }
 0x1e0   :  { %2865 = vrot.lane.b32.xlu1 %v2864_v42, %s2917_s11  ;;  %v1313_v42 = vrot.slane %v4414_v38, 2  ;;  %v4576_v1 = vsel %vm217_vm3, %v1370_v10, %v1371_v45 }
 0x1e1   :  { %2875 = vrot.lane.b32.xlu0 %v2874_v9, %s2917_s11  ;;  %v4533_v9 = vsel %vm217_vm3, %v1304_v51, %v1305_v27  ;;  %v1317_v51 = vrot.slane %v4446_v15, 2  ;;  %v1319_v27 = vrot.slane %v4460_v11, 2  ;;  %4988 = vst [vmem:[#allocation11_spill] sm:$0xff] %v4576_v1 }
 0x1e2   :  { %v4551_v31 = vsel %vm217_vm3, %v1313_v42, %v1314_v14 }
 0x1e3   :  { %v4563_v15 = vsel %vm217_vm3, %v1316_v19, %v1317_v51  ;;  %v4567_v42 = vsel %vm217_vm3, %v1319_v27, %v1320_v21 }
 0x1e4   :  { %2870 = vrot.lane.b32.xlu1 %v2869_v32, %s2917_s11  ;;  %v1380_v32 = vrot.slane %v4526_v24, 1  ;;  %v1323_v24 = vrot.slane %v4470_v25, 2 }
 0x1e5   :  { %2880 = vrot.lane.b32.xlu0 %v2879_v8, %s2917_s11  ;;  %v1381_v8 = vrot.slane %v4528_v20, 1  ;;  %v1348_v20 = vrot.slane %v4512_v26, 1 }
 0x1e6   :  { %v4570_v25 = vsel %vm217_vm3, %v1322_v56, %v1323_v24  ;;  %v1277_v56 = vrot.slane %v4088_v23, 2 }
 0x1e7   :  { %v1382_v37 = vsel %vm168_vm2, %v1380_v32, %v1381_v8  ;;  %v4573_v14 = vsel %vm168_vm2, %v1348_v20, %v1349_v54  ;;  %v1278_v54 = vrot.slane %v4090_v35, 2 }
 0x1e8   :  { %1501 = vrot.lane.b32.xlu1 %v4533_v9, %s2917_s11  ;;  %v2884_v32 = vpack.i.bf16 %v4570_v25, %v4573_v14  ;;  %v2889_v8 = vpack.i.bf16 %v4576_v1, %v1382_v37  ;;  %v1667_v37 = vld [vmem:[%s4944_s3 + $0x230] sm:$0xff] }
 0x1e9   :  { %1503 = vrot.lane.b32.xlu0 %v4536_v43, %s2917_s11  ;;  %v1279_v20 = vsel %vm217_vm3, %v1277_v56, %v1278_v54 }
 0x1ec   :  { %1505 = vrot.lane.b32.xlu1 %v4545_v41, %s2917_s11 }
 0x1ed   :  { %1507 = vrot.lane.b32.xlu0 %v4551_v31, %s2917_s11 }
 0x1f0   :  { %1509 = vrot.lane.b32.xlu1 %v4563_v15, %s2917_s11 }
 0x1f1   :  { %1511 = vrot.lane.b32.xlu0 %v4567_v42, %s2917_s11 }
 0x1f4   :  { %2885 = vrot.lane.b32.xlu1 %v2884_v32, %s2917_s11 }
 0x1f5   :  { %2890 = vrot.lane.b32.xlu0 %v2889_v8, %s2917_s11 }
 0x22e   :  { %v2781_v24 = vpop.permute.xlu0 %2780 }
 0x22f   :  { %v2783_v19 = vunpack.i.h.bf16 %v2781_v24  ;;  %v2782_v51 = vunpack.i.l.bf16 %v2781_v24 }
 0x231   :  { %v1561_v27 = vsel %vm21_vm0, %v1279_v20, %v2782_v51  ;;  %v1545_v21 = vsel %vm21_vm0, %v4088_v23, %v2783_v19  ;;  %v1666_v19 = vld [vmem:[%s4944_s3 + $0x228] sm:$0xff] }
 0x232   :  { %v2786_v10 = vpop.permute.xlu1 %2785  ;;  %v2791_v45 = vpop.permute.xlu0 %2790  ;;  %1772 = vmatprep.mubr.f32.mxu1 %v1561_v27 }
 0x233   :  { %v2788_v32 = vunpack.i.h.bf16 %v2786_v10  ;;  %v2787_v8 = vunpack.i.l.bf16 %v2786_v10  ;;  %v2793_v35 = vunpack.i.h.bf16 %v2791_v45  ;;  %v2792_v1 = vunpack.i.l.bf16 %v2791_v45  ;;  %1773 = vmatmul.mubr.f32.vlgmr.msra.gmra.mxu1 %v1545_v21  ;;  %v1663_v45 = vld [vmem:[%s4944_s3 + $0x210] sm:$0xff] }
 0x234   :  { %2635 = vmatpush3.msra.mxu1 %v4172_v18 }
 0x235   :  { %v1562_v56 = vsel %vm21_vm0, %v4373_v4, %v2787_v8  ;;  %v1547_v23 = vsel %vm21_vm0, %v4205_v30, %v2793_v35  ;;  %2636 = vmatprep.subr.mxu1 %v1667_v37  ;;  %v1546_v20 = vsel %vm21_vm0, %v4227_v47, %v2788_v32  ;;  %v1563_v18 = vsel %vm21_vm0, %v4376_v50, %v2792_v1  ;;  %v1665_v30 = vld [vmem:[%s4944_s3 + $0x220] sm:$0xff]  ;;  %v1664_v47 = vld [vmem:[%s4944_s3 + $0x218] sm:$0xff] }
 0x236   :  { %v2796_v54 = vpop.permute.xlu1 %2795  ;;  %1777 = vmatprep.mubr.f32.mxu1 %v1562_v56  ;;  %1917 = vmatprep.mubr.f32.mxu0 %v1547_v23  ;;  %v1662_v56 = vld [vmem:[%s4944_s3 + $0x208] sm:$0xff] }
 0x237   :  { %v2801_v24 = vpop.permute.xlu0 %2800  ;;  %v2797_v51 = vunpack.i.l.bf16 %v2796_v54  ;;  %1778 = vmatmul.mubr.f32.gmra.mxu1 %v1546_v20  ;;  %v2798_v4 = vunpack.i.h.bf16 %v2796_v54 }
 0x238   :  { %1782 = vmatprep.mubr.f32.mxu1 %v1563_v18  ;;  %2637 = vmatpush3.msra.mxu1 %v1667_v37  ;;  %v2802_v10 = vunpack.i.l.bf16 %v2801_v24  ;;  %v2803_v37 = vunpack.i.h.bf16 %v2801_v24 }
 0x239   :  { %2638 = vmatprep.subr.mxu1 %v1666_v19  ;;  %v1564_v1 = vsel %vm21_vm0, %v4421_v49, %v2797_v51  ;;  %v1548_v35 = vsel %vm21_vm0, %v4267_v48, %v2798_v4  ;;  %v1661_v48 = vld [vmem:[%s4944_s3 + $0x200] sm:$0xff] }
 0x23a   :  { %v2806_v27 = vpop.permute.xlu1 %2805  ;;  %2639 = vmatpush3.msra.mxu1 %v1666_v19  ;;  %v1565_v20 = vsel %vm21_vm0, %v4424_v2, %v2802_v10 }
 0x23b   :  { %v4611_v21 = vpop.permute.xlu0 %2810  ;;  %1783 = vmatmul.mubr.f32.gmra.mxu1 %v1547_v23  ;;  %2640 = vmatprep.subr.mxu1 %v1665_v30  ;;  %v2807_v23 = vunpack.i.l.bf16 %v2806_v27  ;;  %v2808_v19 = vunpack.i.h.bf16 %v2806_v27 }
 0x23c   :  { %1787 = vmatprep.mubr.f32.mxu1 %v1564_v1  ;;  %2641 = vmatpush3.msra.mxu1 %v1665_v30  ;;  %v1549_v30 = vsel %vm21_vm0, %v4243_v22, %v2803_v37  ;;  %v2812_v4 = vunpack.i.l.bf16 %v4611_v21  ;;  %v2813_v10 = vunpack.i.h.bf16 %v4611_v21  ;;  %v1301_v21 = vrot.slane %v4113_v17, 2 }
 0x23d   :  { %2642 = vmatprep.subr.mxu1 %v1664_v47 }
 0x23e   :  { %v4621_v32 = vpop.permute.xlu1 %2815  ;;  %2643 = vmatpush3.msra.mxu1 %v1664_v47 }
 0x23f   :  { %v4623_v8 = vpop.permute.xlu0 %2820  ;;  %1788 = vmatmul.mubr.f32.gmra.mxu1 %v1548_v35  ;;  %2644 = vmatprep.subr.mxu1 %v1663_v45  ;;  %v2817_v37 = vunpack.i.l.bf16 %v4621_v32 }
 0x240   :  { %v2822_v54 = vunpack.i.l.bf16 %v4623_v8  ;;  %1792 = vmatprep.mubr.f32.mxu1 %v1565_v20  ;;  %2645 = vmatpush3.msra.mxu1 %v1663_v45  ;;  %v1550_v45 = vsel %vm21_vm0, %v4309_v39, %v2808_v19  ;;  %v2818_v39 = vunpack.i.h.bf16 %v4621_v32  ;;  %v2823_v19 = vunpack.i.h.bf16 %v4623_v8 }
 0x241   :  { %2646 = vmatprep.subr.mxu1 %v1662_v56 }
 0x242   :  { %v1577_v24 = vsel %vm21_vm0, %v4265_v5, %v2822_v54  ;;  %v2826_v51 = vpop.permute.xlu1 %2825  ;;  %2647 = vmatpush3.msra.mxu1 %v1662_v56  ;;  %v1566_v5 = vsel %vm21_vm0, %v4444_v16, %v2807_v23  ;;  %v1302_v56 = vrot.slane %v4122_v13, 2  ;;  %v1568_v13 = vsel %vm21_vm0, %v4495_v60, %v2817_v37 }
 0x243   :  { %v4638_v18 = vpop.permute.xlu0 %2830  ;;  %1918 = vmatmul.mubr.f32.vlgmr.msra.gmra.mxu0 %v1577_v24  ;;  %v2828_v47 = vunpack.i.h.bf16 %v2826_v51  ;;  %1793 = vmatmul.mubr.f32.gmra.mxu1 %v1549_v30 }
 0x244   :  { %1922 = vmatprep.mubr.f32.mxu0 %v1548_v35  ;;  %1797 = vmatprep.mubr.f32.mxu1 %v1566_v5  ;;  %v2832_v8 = vunpack.i.l.bf16 %v4638_v18 }
 0x245   :  { %2648 = vmatprep.subr.mxu1 %v1661_v48  ;;  %v1578_v27 = vsel %vm21_vm0, %v4270_v46, %v2828_v47  ;;  %v1567_v46 = vsel %vm21_vm0, %v4473_v62, %v2812_v4  ;;  %v2827_v4 = vunpack.i.l.bf16 %v2826_v51  ;;  %v2833_v51 = vunpack.i.h.bf16 %v4638_v18 }
 0x246   :  { %2649 = vmatpush3.msra.mxu1 %v1661_v48  ;;  %v4648_v1 = vpop.permute.xlu1 %2835  ;;  %v1551_v48 = vsel %vm21_vm0, %v4285_v34, %v2813_v10  ;;  %v1552_v34 = vsel %vm21_vm0, %v4334_v63, %v2818_v39 }
 0x247   :  { %v4650_v22 = vpop.permute.xlu0 %2840  ;;  %1923 = vmatmul.mubr.f32.gmra.mxu0 %v1578_v27  ;;  %v2837_v35 = vunpack.i.l.bf16 %v4648_v1  ;;  %1798 = vmatmul.mubr.f32.gmra.mxu1 %v1550_v45  ;;  %v1553_v63 = vsel %vm21_vm0, %v4113_v17, %v2827_v4  ;;  %v1554_v17 = vsel %vm21_vm0, %v4370_v57, %v2833_v51 }
 0x248   :  { %1927 = vmatprep.mubr.f32.mxu0 %v1549_v30  ;;  %1802 = vmatprep.mubr.f32.mxu1 %v1567_v46  ;;  %v2843_v23 = vunpack.i.h.bf16 %v4650_v22  ;;  %v2842_v18 = vunpack.i.l.bf16 %v4650_v22 }
 0x249   :  { %v1579_v54 = vsel %vm21_vm0, %v4307_v12, %v2837_v35  ;;  %v1303_v12 = vsel %vm217_vm3, %v1301_v21, %v1302_v56  ;;  %v2838_v35 = vunpack.i.h.bf16 %v4648_v1  ;;  %v1570_v21 = vsel %vm21_vm0, %v4533_v9, %v2832_v8 }
 0x24a   :  { %v4664_v20 = vpop.permute.xlu1 %2845  ;;  %v1580_v30 = vsel %vm21_vm0, %v4297_v58, %v2843_v23  ;;  %v1569_v27 = vsel %vm21_vm0, %v1303_v12, %v2823_v19  ;;  %v1555_v57 = vsel %vm21_vm0, %v4361_v6, %v2842_v18 }
 0x24b   :  { %v4666_v24 = vpop.permute.xlu0 %2850  ;;  %1928 = vmatmul.mubr.f32.gmra.mxu0 %v1579_v54  ;;  %1803 = vmatmul.mubr.f32.gmra.mxu1 %v1551_v48  ;;  %v2847_v39 = vunpack.i.l.bf16 %v4664_v20  ;;  %v1571_v9 = vsel %vm21_vm0, %v4536_v43, %v2838_v35 }
 0x24c   :  { %1932 = vmatprep.mubr.f32.mxu0 %v1550_v45  ;;  %1807 = vmatprep.mubr.f32.mxu1 %v1568_v13  ;;  %v2852_v32 = vunpack.i.l.bf16 %v4666_v24  ;;  %v2853_v19 = vunpack.i.h.bf16 %v4666_v24 }
 0x24d   :  { %v1572_v12 = vsel %vm21_vm0, %v4545_v41, %v2847_v39  ;;  %v4992_v39 = vld [vmem:[#allocation14_spill] sm:$0xff] }
 0x24e   :  { %v4677_v47 = vpop.permute.xlu1 %2855  ;;  %v1581_v58 = vsel %vm21_vm0, %v4332_v3, %v2852_v32  ;;  %v1573_v24 = vsel %vm21_vm0, %v4551_v31, %v2853_v19 }
 0x24f   :  { %v4679_v5 = vpop.permute.xlu0 %2860  ;;  %1933 = vmatmul.mubr.f32.gmra.mxu0 %v1580_v30  ;;  %1808 = vmatmul.mubr.f32.gmra.mxu1 %v1552_v34  ;;  %v2858_v10 = vunpack.i.h.bf16 %v4677_v47 }
 0x250   :  { %1937 = vmatprep.mubr.f32.mxu0 %v1551_v48  ;;  %1812 = vmatprep.mubr.f32.mxu1 %v1569_v27  ;;  %v2863_v45 = vunpack.i.h.bf16 %v4679_v5  ;;  %v2848_v48 = vunpack.i.h.bf16 %v4664_v20  ;;  %v2857_v20 = vunpack.i.l.bf16 %v4677_v47  ;;  %v2862_v30 = vunpack.i.l.bf16 %v4679_v5 }
 0x251   :  { %v1582_v3 = vsel %vm21_vm0, %v4337_v36, %v2858_v10 }
 0x252   :  { %v2866_v37 = vpop.permute.xlu1 %2865  ;;  %v1593_v1 = vsel %vm21_vm0, %v4365_v29, %v2863_v45  ;;  %v1556_v6 = vsel %vm21_vm0, %v4396_v44, %v2848_v48  ;;  %v1574_v44 = vsel %vm21_vm0, %v4563_v15, %v2862_v30 }
 0x253   :  { %1938 = vmatmul.mubr.f32.gmra.mxu0 %v1581_v58  ;;  %v2876_v46 = vpop.permute.xlu0 %2875  ;;  %1813 = vmatmul.mubr.f32.gmra.mxu1 %v1553_v63  ;;  %v2868_v56 = vunpack.i.h.bf16 %v2866_v37  ;;  %v2867_v8 = vunpack.i.l.bf16 %v2866_v37 }
 0x254   :  { %1942 = vmatprep.mubr.f32.mxu0 %v1552_v34  ;;  %1817 = vmatprep.mubr.f32.mxu1 %v1570_v21  ;;  %v2878_v23 = vunpack.i.h.bf16 %v2876_v46  ;;  %v2877_v47 = vunpack.i.l.bf16 %v2876_v46 }
 0x255   :  { %v1583_v22 = vsel %vm21_vm0, %v4368_v61, %v2868_v56 }
 0x256   :  { %v2871_v54 = vpop.permute.xlu1 %2870  ;;  %v1594_v29 = vsel %vm21_vm0, %v4437_v40, %v2878_v23 }
 0x257   :  { %1943 = vmatmul.mubr.f32.gmra.mxu0 %v1582_v3  ;;  %1818 = vmatmul.mubr.f32.gmra.mxu1 %v1554_v17  ;;  %v2873_v36 = vunpack.i.h.bf16 %v2871_v54  ;;  %v2881_v13 = vpop.permute.xlu0 %2880  ;;  %v2872_v10 = vunpack.i.l.bf16 %v2871_v54  ;;  %v4991_v17 = vld [vmem:[#allocation13_spill] sm:$0xff] }
 0x258   :  { %1947 = vmatprep.mubr.f32.mxu0 %v1593_v1  ;;  %1822 = vmatprep.mubr.f32.mxu1 %v1571_v9  ;;  %v2882_v58 = vunpack.i.l.bf16 %v2881_v13  ;;  %v2883_v63 = vunpack.i.h.bf16 %v2881_v13 }
 0x259   :  { %v1584_v61 = vsel %vm21_vm0, %v4476_v53, %v2873_v36  ;;  %v1557_v53 = vsel %vm21_vm0, %v4414_v38, %v2857_v20  ;;  %v1575_v38 = vsel %vm21_vm0, %v4567_v42, %v2877_v47 }
 0x25a   :  { %v1502_v32 = vpop.permute.xlu1 %1501  ;;  %v1560_v21 = vsel %vm21_vm0, %v4466_v59, %v2883_v63  ;;  %v4989_v59 = vld [vmem:[#allocation8_spill] sm:$0xff] }
 0x25b   :  { %1948 = vmatmul.mubr.f32.gmra.mxu0 %v1583_v22  ;;  %1823 = vmatmul.mubr.f32.gmra.mxu1 %v1555_v57  ;;  %v1504_v4 = vpop.permute.xlu0 %1503  ;;  %v1585_v34 = vsel %vm21_vm0, %v4394_v0, %v1502_v32  ;;  %v1558_v0 = vsel %vm21_vm0, %v4433_v52, %v2867_v8  ;;  %v1576_v52 = vsel %vm21_vm0, %v4570_v25, %v2882_v58 }
 0x25c   :  { %1952 = vmatprep.mubr.f32.mxu0 %v1594_v29  ;;  %1827 = vmatprep.mubr.f32.mxu1 %v1572_v12  ;;  %v1586_v5 = vsel %vm21_vm0, %v4408_v7, %v1504_v4  ;;  %v1559_v7 = vsel %vm21_vm0, %v4460_v11, %v2872_v10 }
 0x25e   :  { %v1506_v27 = vpop.permute.xlu1 %1505 }
 0x25f   :  { %1953 = vmatmul.mubr.f32.gmra.mxu0 %v1584_v61  ;;  %1828 = vmatmul.mubr.f32.gmra.mxu1 %v1556_v6  ;;  %v1508_v51 = vpop.permute.xlu0 %1507  ;;  %v1587_v37 = vsel %vm21_vm0, %v4431_v55, %v1506_v27 }
 0x260   :  { %1957 = vmatprep.mubr.f32.mxu0 %v1555_v57  ;;  %1832 = vmatprep.mubr.f32.mxu1 %v1573_v24  ;;  %v1588_v46 = vsel %vm21_vm0, %v4458_v33, %v1508_v51 }
 0x262   :  { %v1510_v45 = vpop.permute.xlu1 %1509 }
 0x263   :  { %1958 = vmatmul.mubr.f32.gmra.mxu0 %v1585_v34  ;;  %1833 = vmatmul.mubr.f32.gmra.mxu1 %v1557_v53  ;;  %v1512_v35 = vpop.permute.xlu0 %1511  ;;  %v1589_v11 = vsel %vm21_vm0, %v4487_v28, %v1510_v45  ;;  %v4990_v28 = vld [vmem:[#allocation7_spill] sm:$0xff] }
 0x264   :  { %1962 = vmatprep.mubr.f32.mxu0 %v1556_v6  ;;  %1837 = vmatprep.mubr.f32.mxu1 %v1574_v44  ;;  %v1590_v18 = vsel %vm21_vm0, %v4989_v59, %v1512_v35 }
 0x266   :  { %v2886_v55 = vpop.permute.xlu1 %2885 }
 0x267   :  { %1963 = vmatmul.mubr.f32.gmra.mxu0 %v1586_v5  ;;  %1838 = vmatmul.mubr.f32.gmra.mxu1 %v1558_v0  ;;  %v2887_v56 = vunpack.i.l.bf16 %v2886_v55  ;;  %v2891_v3 = vpop.permute.xlu0 %2890  ;;  %v2888_v33 = vunpack.i.h.bf16 %v2886_v55 }
 0x268   :  { %1967 = vmatprep.mubr.f32.mxu0 %v1557_v53  ;;  %1842 = vmatprep.mubr.f32.mxu1 %v1575_v38  ;;  %v2892_v23 = vunpack.i.l.bf16 %v2891_v3  ;;  %v2893_v54 = vunpack.i.h.bf16 %v2891_v3 }
 0x269   :  { %v1591_v1 = vsel %vm21_vm0, %v4991_v17, %v2888_v33 }
 0x26a   :  { %v1596_v9 = vsel %vm21_vm0, %v4992_v39, %v2892_v23 }
 0x26b   :  { %1968 = vmatmul.mubr.f32.gmra.mxu0 %v1587_v37  ;;  %1843 = vmatmul.mubr.f32.gmra.mxu1 %v1559_v7 }
 0x26c   :  { %1972 = vmatprep.mubr.f32.mxu0 %v1558_v0  ;;  %1847 = vmatprep.mubr.f32.mxu1 %v1576_v52 }
 0x26f   :  { %1973 = vmatmul.mubr.f32.gmra.mxu0 %v1588_v46  ;;  %1848 = vmatmul.mubr.f32.gmra.mxu1 %v1560_v21 }
 0x270   :  { %1977 = vmatprep.mubr.f32.mxu0 %v1559_v7  ;;  %2650 = vmatprep.mubr.msk.f32.mxu1 %vm21_vm0, %v4376_v50  ;;  %v1595_v50 = vsel %vm21_vm0, %v4512_v26, %v2887_v56  ;;  %v4994_v26 = vld [vmem:[#allocation10_spill] sm:$0xff] }
 0x273   :  { %1978 = vmatmul.mubr.f32.gmra.mxu0 %v1589_v11  ;;  %2651 = vmatmul.mubr.msk.f32.vlgmr.msra.gmra.mxu1 %vm21_vm0, %v4421_v49  ;;  %v1383_v49 = vrot.slane %v4437_v40, 2  ;;  %v1592_v40 = vsel %vm21_vm0, %v4573_v14, %v2893_v54  ;;  %v1387_v14 = vrot.slane %v4994_v26, 2 }
 0x274   :  { %1982 = vmatprep.mubr.f32.mxu0 %v1560_v21  ;;  %2653 = vmatprep.mubr.msk.f32.mxu1 %vm21_vm0, %v4424_v2  ;;  %v1384_v2 = vrot.slane %v4990_v28, 2 }
 0x277   :  { %1983 = vmatmul.mubr.f32.gmra.mxu0 %v1590_v18  ;;  %2654 = vmatmul.mubr.msk.f32.gmra.mxu1 %vm21_vm0, %v4444_v16  ;;  %v4993_v16 = vld [vmem:[#allocation9_spill] sm:$0xff] }
 0x278   :  { %1987 = vmatprep.mubr.f32.mxu0 %v1595_v50  ;;  %2656 = vmatprep.mubr.msk.f32.mxu1 %vm21_vm0, %v4473_v62  ;;  %v1385_v62 = vsel %vm217_vm3, %v1383_v49, %v1384_v2 }
 0x27b   :  { %1988 = vmatmul.mubr.f32.gmra.mxu0 %v1591_v1  ;;  %2657 = vmatmul.mubr.msk.f32.gmra.mxu1 %vm21_vm0, %v4495_v60  ;;  %v1386_v60 = vrot.slane %v4992_v39, 2 }
 0x27c   :  { %1992 = vmatprep.mubr.f32.mxu0 %v1596_v9  ;;  %2659 = vmatprep.mubr.msk.f32.mxu1 %vm21_vm0, %v4993_v16  ;;  %v4854_v16 = vld [vmem:[%s4945_s4] ss:$0 sm:$0xff]  ;;  %s2918_s4 = smov [#allocation4]  }
 0x27d   :  { %s2181_s0 = sshll.u32 %s2918_s4, 4  ;;  %s2182_s0 = int_to_ptr.vmem [resolvable:$true] %s2181_s0 }
 0x27e   :  { %s2894_s6 = scalar_lea.vmem %s2182_s0, 2048  ;;  %p2899_p1 = scmp.lt.s32.totalorder %s2182_s0, %s2182_s0 }
 0x27f   :  { %1993 = vmatmul.mubr.f32.gmra.mxu0 %v1592_v40  ;;  %2660 = vmatmul.mubr.msk.f32.gmra.mxu1 %vm21_vm0, %v1385_v62  ;;  %p2895_p0 = scmp.ne.s32.totalorder %s2182_s0, %s2894_s6  ;;  %p2900_p2 = scmp.lt.s32.totalorder %s2894_s6, %s2894_s6 }
 0x280   :  { %2662 = vmatprep.mubr.msk.f32.mxu1 %vm21_vm0, %v4536_v43  ;;  %v4995_v43 = vld [vmem:[#allocation11_spill] sm:$0xff] }
 0x281   :  { %p2901_p3 = por %p2900_p2, %p2899_p1 }
 0x283   :  { %2663 = vmatmul.mubr.msk.f32.gmra.mxu1 %vm21_vm0, %v4545_v41  ;;  %v1388_v41 = vsel %vm217_vm3, %v1386_v60, %v1387_v14  ;;  %p2902_p4 = pnand %p2901_p3, %p2895_p0 }
 0x284   :  { %2665 = vmatprep.mubr.msk.f32.mxu1 %vm21_vm0, %v4551_v31 }
 0x287   :  { %2666 = vmatmul.mubr.msk.f32.gmra.mxu1 %vm21_vm0, %v4563_v15 }
 0x288   :  { %2668 = vmatprep.mubr.msk.f32.mxu1 %vm21_vm0, %v4567_v42 }
 0x28b   :  { %2669 = vmatmul.mubr.msk.f32.gmra.mxu1 %vm21_vm0, %v4570_v25 }
 0x28c   :  { %2671 = vmatprep.mubr.msk.f32.mxu1 %vm21_vm0, %v4995_v43 }
 0x28f   :  { %2672 = vmatmul.mubr.msk.f32.gmra.mxu1 %vm21_vm0, %v1388_v41 }
 0x2f3   :  { %v2442_v31 = vpop.f32.mrf.mxu1 }
 0x2f5   :  { %v2443_v36 = vpop.f32.mrf.mxu1 }
 0x2f6   :  { %v2444_v1 = vadd.f32 %v2443_v36, %v2442_v31 }
 0x2f7   :  { %v2445_v15 = vpop.f32.mrf.mxu1 }
 0x2f8   :  { %v1775_v31 = vadd.f32 %v2444_v1, %v4854_v16 }
 0x2f9   :  { %v2446_v22 = vpop.f32.mrf.mxu1 }
 0x2fa   :  { %v2447_v2 = vadd.f32 %v2446_v22, %v2445_v15 }
 0x2fb   :  { %v2448_v48 = vpop.f32.mrf.mxu1 }
 0x2fc   :  { %v1780_v40 = vadd.f32 %v2447_v2, %v4854_v16 }
 0x2fd   :  { %v2449_v42 = vpop.f32.mrf.mxu1 }
 0x2fe   :  { %v2450_v43 = vadd.f32 %v2449_v42, %v2448_v48 }
 0x2ff   :  { %v2451_v57 = vpop.f32.mrf.mxu1 }
 0x301   :  { %v2452_v29 = vpop.f32.mrf.mxu1 }
 0x302   :  { %v2453_v60 = vadd.f32 %v2452_v29, %v2451_v57  ;;  %v1785_v29 = vadd.f32 %v2450_v43, %v4854_v16 }
 0x303   :  { %v2522_v19 = vpop.f32.mrf.mxu0  ;;  %v4793_v13 = vpop.f32.mrf.mxu1 }
 0x305   :  { %v2523_v12 = vpop.f32.mrf.mxu0  ;;  %v4795_v25 = vpop.f32.mrf.mxu1 }
 0x306   :  { %v2524_v26 = vadd.f32 %v2523_v12, %v2522_v19  ;;  %v2456_v48 = vadd.f32 %v4795_v25, %v4793_v13 }
 0x307   :  { %v2525_v32 = vpop.f32.mrf.mxu0  ;;  %v2457_v61 = vpop.f32.mrf.mxu1 }
 0x308   :  { %v1920_v57 = vadd.f32 %v2524_v26, %v1775_v31 }
 0x309   :  { %v2526_v20 = vpop.f32.mrf.mxu0  ;;  %v2458_v6 = vpop.f32.mrf.mxu1 }
 0x30a   :  { %v2527_v39 = vadd.f32 %v2526_v20, %v2525_v32  ;;  %v2459_v32 = vadd.f32 %v2458_v6, %v2457_v61 }
 0x30b   :  { %v2528_v30 = vpop.f32.mrf.mxu0  ;;  %v4797_v24 = vpop.f32.mrf.mxu1 }
 0x30c   :  { %v1925_v22 = vadd.f32 %v2527_v39, %v1780_v40  ;;  %v1800_v6 = vadd.f32 %v2459_v32, %v4854_v16 }
 0x30d   :  { %v2529_v4 = vpop.f32.mrf.mxu0  ;;  %v4799_v34 = vpop.f32.mrf.mxu1 }
 0x30f   :  { %v2531_v8 = vpop.f32.mrf.mxu0  ;;  %v4801_v53 = vpop.f32.mrf.mxu1 }
 0x311   :  { %v2532_v47 = vpop.f32.mrf.mxu0  ;;  %v2464_v27 = vpop.f32.mrf.mxu1 }
 0x312   :  { %v2533_v36 = vadd.f32 %v2532_v47, %v2531_v8 }
 0x313   :  { %v4803_v44 = vpop.f32.mrf.mxu0  ;;  %v4805_v5 = vpop.f32.mrf.mxu1 }
 0x315   :  { %v2535_v10 = vpop.f32.mrf.mxu0  ;;  %v4807_v0 = vpop.f32.mrf.mxu1 }
 0x316   :  { %v2536_v1 = vadd.f32 %v2535_v10, %v4803_v44  ;;  %v2468_v31 = vadd.f32 %v4807_v0, %v4805_v5 }
 0x317   :  { %v2537_v58 = vpop.f32.mrf.mxu0  ;;  %v4809_v51 = vpop.f32.mrf.mxu1 }
 0x319   :  { %v2538_v38 = vpop.f32.mrf.mxu0  ;;  %v4811_v45 = vpop.f32.mrf.mxu1 }
 0x31a   :  { %v2539_v19 = vadd.f32 %v2538_v38, %v2537_v58  ;;  %v1795_v58 = vadd.f32 %v2456_v48, %v4854_v16  ;;  %v2462_v38 = vadd.f32 %v4799_v34, %v4797_v24  ;;  %v2471_v10 = vadd.f32 %v4811_v45, %v4809_v51 }
 0x31b   :  { %v4813_v37 = vpop.f32.mrf.mxu0  ;;  %v4815_v63 = vpop.f32.mrf.mxu1 }
 0x31d   :  { %v4817_v7 = vpop.f32.mrf.mxu0  ;;  %v4819_v52 = vpop.f32.mrf.mxu1 }
 0x31e   :  { %v2542_v43 = vadd.f32 %v4817_v7, %v4813_v37  ;;  %v1820_v37 = vadd.f32 %v2471_v10, %v4854_v16  ;;  %v2474_v48 = vadd.f32 %v4819_v52, %v4815_v63 }
 0x31f   :  { %v2543_v35 = vpop.f32.mrf.mxu0  ;;  %v4821_v46 = vpop.f32.mrf.mxu1 }
 0x321   :  { %v2544_v21 = vpop.f32.mrf.mxu0  ;;  %v4823_v55 = vpop.f32.mrf.mxu1 }
 0x322   :  { %v2477_v7 = vadd.f32 %v4823_v55, %v4821_v46 }
 0x323   :  { %v4825_v11 = vpop.f32.mrf.mxu0  ;;  %v4827_v56 = vpop.f32.mrf.mxu1 }
 0x325   :  { %v4829_v3 = vpop.f32.mrf.mxu0  ;;  %v4831_v33 = vpop.f32.mrf.mxu1 }
 0x327   :  { %v4833_v59 = vpop.f32.mrf.mxu0  ;;  %v4835_v18 = vpop.f32.mrf.mxu1 }
 0x329   :  { %v4837_v23 = vpop.f32.mrf.mxu0  ;;  %v4839_v50 = vpop.f32.mrf.mxu1 }
 0x32a   :  { %v2551_v51 = vadd.f32 %v4837_v23, %v4833_v59  ;;  %v1815_v23 = vadd.f32 %v2468_v31, %v4854_v16 }
 0x32b   :  { %v4841_v49 = vpop.f32.mrf.mxu0  ;;  %v4843_v28 = vpop.f32.mrf.mxu1 }
 0x32c   :  { %4996 = vst [vmem:[#allocation12_spill] sm:$0xff] %v4843_v28  ;;  %v2530_v28 = vadd.f32 %v2529_v4, %v2528_v30  ;;  %v2465_v30 = vadd.f32 %v2464_v27, %v4801_v53  ;;  %v1945_v27 = vadd.f32 %v2539_v19, %v1800_v6 }
 0x32d   :  { %v4845_v54 = vpop.f32.mrf.mxu0  ;;  %v4847_v17 = vpop.f32.mrf.mxu1 }
 0x32e   :  { %4997 = vst [vmem:[#allocation15_spill] sm:$0xff] %v4847_v17  ;;  %v1790_v17 = vadd.f32 %v2453_v60, %v4854_v16  ;;  %v1930_v25 = vadd.f32 %v2530_v28, %v1785_v29  ;;  %v1810_v44 = vadd.f32 %v2465_v30, %v4854_v16  ;;  %v2548_v29 = vadd.f32 %v4829_v3, %v4825_v11 }
 0x32f   :  { %v4849_v9 = vpop.f32.mrf.mxu0  ;;  %v4856_v62 = vpop.f32.mrf.mxu1  ;;  %v1830_v11 = vadd.f32 %v2477_v7, %v4854_v16  ;;  %v2483_v3 = vadd.f32 %v4839_v50, %v4835_v18  ;;  %v2554_v6 = vadd.f32 %v4845_v54, %v4841_v49  ;;  %v2480_v30 = vadd.f32 %v4831_v33, %v4827_v56 }
 0x330   :  { %4998 = vst [vmem:[#allocation8_spill] sm:$0xff] %v4856_v62  ;;  %v1935_v61 = vadd.f32 %v2533_v36, %v1790_v17  ;;  %v2545_v17 = vadd.f32 %v2544_v21, %v2543_v35  ;;  %v1940_v35 = vadd.f32 %v2536_v1, %v1795_v58  ;;  %v1805_v21 = vadd.f32 %v2462_v38, %v4854_v16 }
 0x331   :  { %v4859_v14 = vpop.f32.mrf.mxu0  ;;  %v4861_v41 = vpop.f32.mrf.mxu1  ;;  %v1840_v49 = vadd.f32 %v2483_v3, %v4854_v16 }
 0x332   :  { %v1955_v32 = vadd.f32 %v2545_v17, %v1810_v44  ;;  %v1950_v59 = vadd.f32 %v2542_v43, %v1805_v21  ;;  %v2557_v19 = vadd.f32 %v4859_v14, %v4849_v9  ;;  %v1960_v9 = vadd.f32 %v2548_v29, %v1815_v23 }
 0x333   :  { %v4864_v15 = vpop.f32.mrf.mxu0  ;;  %v2652_v20 = vpop.f32.mrf.mxu1  ;;  %v1825_v14 = vadd.f32 %v2474_v48, %v4854_v16 }
 0x334   :  { %v2070_v62 = vadd.f32 %v2652_v20, %v1925_v22 }
 0x335   :  { %v4867_v2 = vpop.f32.mrf.mxu0  ;;  %v2064_v42 = vpop.f32.mrf.mxu1  ;;  %v5001_v17 = vld [vmem:[#allocation15_spill] sm:$0xff] }
 0x336   :  { %v2144_v12 = vmax.f32 %v2070_v62, 0.0  ;;  %v2065_v8 = vadd.f32 %v2064_v42, %v1920_v57  ;;  %v2560_v38 = vadd.f32 %v4867_v2, %v4864_v15 }
 0x337   :  { %v4872_v47 = vpop.f32.mrf.mxu0  ;;  %v2655_v4 = vpop.f32.mrf.mxu1  ;;  %v4999_v54 = vld [vmem:[#allocation8_spill] sm:$0xff] }
 0x338   :  { %2161 = vst.msk [vmem:[#allocation4 + $0x8] sm:$0xff] %vm2159_vm4, %v2144_v12  ;;  %v2143_v39 = vmax.f32 %v2065_v8, 0.0  ;;  %v2080_v40 = vadd.f32 %v2655_v4, %v1935_v61  ;;  %v1965_v12 = vadd.f32 %v2551_v51, %v1820_v37 }
 0x339   :  { %v2562_v13 = vpop.f32.mrf.mxu0  ;;  %v2074_v62 = vpop.f32.mrf.mxu1 }
 0x33a   :  { %2160 = vst.msk [vmem:[#allocation4] sm:$0xff] %vm2159_vm4, %v2143_v39  ;;  %v2146_v60 = vmax.f32 %v2080_v40, 0.0  ;;  %v2075_v53 = vadd.f32 %v2074_v62, %v1930_v25  ;;  %v2563_v1 = vadd.f32 %v2562_v13, %v4872_v47  ;;  %v1975_v39 = vadd.f32 %v2557_v19, %v1830_v11  ;;  %v5000_v62 = vld [vmem:[#allocation12_spill] sm:$0xff] }
 0x33b   :  { %v4885_v26 = vpop.f32.mrf.mxu0  ;;  %v2658_v28 = vpop.f32.mrf.mxu1  ;;  %v2489_v40 = vadd.f32 %v4861_v41, %v4999_v54  ;;  %v1970_v47 = vadd.f32 %v2554_v6, %v1825_v14  ;;  %v1835_v13 = vadd.f32 %v2480_v30, %v4854_v16 }
 0x33c   :  { %2163 = vst.msk [vmem:[#allocation4 + $0x18] sm:$0xff] %vm2159_vm4, %v2146_v60  ;;  %v2145_v24 = vmax.f32 %v2075_v53, 0.0  ;;  %v2090_v34 = vadd.f32 %v2658_v28, %v1945_v27  ;;  %v2486_v60 = vadd.f32 %v5001_v17, %v5000_v62  ;;  %v1985_v10 = vadd.f32 %v2563_v1, %v1840_v49 }
 0x33d   :  { %v2084_v36 = vpop.f32.mrf.mxu1  ;;  %v2565_v20 = vpop.f32.mrf.mxu0  ;;  %v1850_v28 = vadd.f32 %v2489_v40, %v4854_v16 }
 0x33e   :  { %2162 = vst.msk [vmem:[#allocation4 + $0x10] sm:$0xff] %vm2159_vm4, %v2145_v24  ;;  %v2148_v45 = vmax.f32 %v2090_v34, 0.0  ;;  %v2085_v22 = vadd.f32 %v2084_v36, %v1940_v35  ;;  %v2566_v2 = vadd.f32 %v2565_v20, %v4885_v26  ;;  %v1980_v34 = vadd.f32 %v2560_v38, %v1835_v13 }
 0x33f   :  { %v2661_v57 = vpop.f32.mrf.mxu1  ;;  %v2567_v8 = vpop.f32.mrf.mxu0  ;;  %v1845_v21 = vadd.f32 %v2486_v60, %v4854_v16 }
 0x340   :  { %2165 = vst.msk [vmem:[#allocation4 + $0x28] sm:$0xff] %vm2159_vm4, %v2148_v45  ;;  %v2147_v5 = vmax.f32 %v2085_v22, 0.0  ;;  %v2100_v0 = vadd.f32 %v2661_v57, %v1955_v32 }
 0x341   :  { %v2094_v42 = vpop.f32.mrf.mxu1  ;;  %v2568_v25 = vpop.f32.mrf.mxu0  ;;  %v1990_v37 = vadd.f32 %v2566_v2, %v1845_v21 }
 0x342   :  { %2164 = vst.msk [vmem:[#allocation4 + $0x20] sm:$0xff] %vm2159_vm4, %v2147_v5  ;;  %v2150_v46 = vmax.f32 %v2100_v0, 0.0  ;;  %v2095_v55 = vadd.f32 %v2094_v42, %v1950_v59  ;;  %v2569_v27 = vadd.f32 %v2568_v25, %v2567_v8 }
 0x343   :  { %v2664_v61 = vpop.f32.mrf.mxu1 }
 0x344   :  { %2167 = vst.msk [vmem:[#allocation4 + $0x38] sm:$0xff] %vm2159_vm4, %v2150_v46  ;;  %v2149_v63 = vmax.f32 %v2095_v55, 0.0  ;;  %v2110_v52 = vadd.f32 %v2664_v61, %v1965_v12  ;;  %v1995_v51 = vadd.f32 %v2569_v27, %v1850_v28 }
 0x345   :  { %v2104_v4 = vpop.f32.mrf.mxu1 }
 0x346   :  { %2166 = vst.msk [vmem:[#allocation4 + $0x30] sm:$0xff] %vm2159_vm4, %v2149_v63  ;;  %v2152_v18 = vmax.f32 %v2110_v52, 0.0  ;;  %v2105_v50 = vadd.f32 %v2104_v4, %v1960_v9 }
 0x347   :  { %v2667_v58 = vpop.f32.mrf.mxu1 }
 0x348   :  { %2169 = vst.msk [vmem:[#allocation4 + $0x48] sm:$0xff] %vm2159_vm4, %v2152_v18  ;;  %v2151_v56 = vmax.f32 %v2105_v50, 0.0  ;;  %v2120_v33 = vadd.f32 %v2667_v58, %v1975_v39 }
 0x349   :  { %v2114_v53 = vpop.f32.mrf.mxu1 }
 0x34a   :  { %2168 = vst.msk [vmem:[#allocation4 + $0x40] sm:$0xff] %vm2159_vm4, %v2151_v56  ;;  %v2154_v41 = vmax.f32 %v2120_v33, 0.0  ;;  %v2115_v44 = vadd.f32 %v2114_v53, %v1970_v47 }
 0x34b   :  { %v2670_v15 = vpop.f32.mrf.mxu1 }
 0x34c   :  { %2171 = vst.msk [vmem:[#allocation4 + $0x58] sm:$0xff] %vm2159_vm4, %v2154_v41  ;;  %v2153_v43 = vmax.f32 %v2115_v44, 0.0  ;;  %v2130_v24 = vadd.f32 %v2670_v15, %v1985_v10 }
 0x34d   :  { %v2124_v35 = vpop.f32.mrf.mxu1 }
 0x34e   :  { %2170 = vst.msk [vmem:[#allocation4 + $0x50] sm:$0xff] %vm2159_vm4, %v2153_v43  ;;  %v2156_v31 = vmax.f32 %v2130_v24, 0.0  ;;  %v2125_v36 = vadd.f32 %v2124_v35, %v1980_v34 }
 0x34f   :  { %v2673_v45 = vpop.f32.mrf.mxu1 }
 0x350   :  { %2173 = vst.msk [vmem:[#allocation4 + $0x68] sm:$0xff] %vm2159_vm4, %v2156_v31  ;;  %v2155_v22 = vmax.f32 %v2125_v36, 0.0  ;;  %v2140_v32 = vadd.f32 %v2673_v45, %v1995_v51 }
 0x351   :  { %v2134_v26 = vpop.f32.mrf.mxu1 }
 0x352   :  { %2172 = vst.msk [vmem:[#allocation4 + $0x60] sm:$0xff] %vm2159_vm4, %v2155_v22  ;;  %v2158_v7 = vmax.f32 %v2140_v32, 0.0  ;;  %v2135_v20 = vadd.f32 %v2134_v26, %v1990_v37 }
 0x354   :  { %2175 = vst.msk [vmem:[#allocation4 + $0x78] sm:$0xff] %vm2159_vm4, %v2158_v7  ;;  %v2157_v16 = vmax.f32 %v2135_v20, 0.0 }
 0x356   :  { %2174 = vst.msk [vmem:[#allocation4 + $0x70] sm:$0xff] %vm2159_vm4, %v2157_v16 }
 0x357   :  { %2905 = shalt.err (!%p2902_p4)
}
 0x358   :  { %s2919_s7 = smov 128   ;;  %s2920_s8 = smov 8  }
 0x359   :  { %2187 = dma.vmem_to_hbm [thread:$0]  %s2182_s0, 2048, %s4946_s5, [#allocation5], %s2919_s7, %s2919_s7, %s2920_s8  }
 0x35a   :  { %2914 = dma.done.wait [#allocation5], 2048  }
 0x35b   :  { %2915 = vsyncadd [#allocation5], 4294965248 }
 0x35c   :  { %2191 = vsyncpa [#allocation5], 1 }

</bundles_post_ra>
